<compile_context>
chip_gen: v5e
topology: v5e:2x2
jax: 0.10.0
libtpu: 0.0.40
codegen_flags: <defaults>
</compile_context>

<pallas_src>
import numpy as np
import jax
import jax.numpy as jnp
from jax.experimental import pallas as pl
from jax.experimental.pallas import tpu as pltpu

EPS = 1e-5          # layer_norm_eps of the PyTorch module
CONV_K = 7
CONV_PAD = 3
T_PAD = 8           # zero-pad T by 3 (front) + 5 (back): keeps sublane dim a multiple of 8


def _layer_norm(x, g, b):
    m = jnp.mean(x, axis=-1, keepdims=True)
    v = jnp.mean((x - m) ** 2, axis=-1, keepdims=True)
    return (x - m) * jax.lax.rsqrt(v + EPS) * g + b


# ----------------------------- conv positional-embedding kernel -----------------------------

def conv_pos_kernel(xp_ref, cw_ref, cb_ref, o_ref):
    """h0 = x + depthwise_conv1d(x, k=7, pad=3) + bias, NWC layout, f32."""
    xp = xp_ref[...]                                      # (bt, T+8, D), zero-padded
    T = o_ref.shape[1]
    acc = xp[:, CONV_PAD:CONV_PAD + T, :] + cb_ref[...]   # residual x + conv bias
    for k in range(CONV_K):                               # static taps, sublane slices
        acc = acc + xp[:, k:k + T, :] * cw_ref[k]         # cw_ref[k]: (1, D)
    o_ref[...] = acc


# ----------------------------- fused encoder kernel -----------------------------

def make_encoder_kernel(n_heads, matmul_dtype=jnp.bfloat16):
    def kernel(h0_ref, wqkv_ref, bqkv_ref, wo_ref, bo_ref,
               g1_ref, be1_ref, w1_ref, b1_ref, w2_ref, b2_ref, g2_ref, be2_ref,
               gf_ref, bf_ref, o_ref):
        l = pl.program_id(1)
        n_layers = pl.num_programs(1)
        bt, T, D = o_ref.shape
        H = n_heads
        dh = D // H
        md = matmul_dtype

        # Layer-0 input = conv positional-embedding result (computed by conv_pos_kernel).
        @pl.when(l == 0)
        def _():
            o_ref[...] = h0_ref[...]

        # ---- encoder layer l (post-norm, relu, dropout = identity at eval)
        x = o_ref[...]                                    # (bt, T, D) f32, VMEM-resident
        xm = x.reshape(bt * T, D).astype(md)

        # Fused Q/K/V projection: one full-width MXU pass.  1/sqrt(dh) already folded
        # into the Q columns / bias at pack time.
        qkv = (jnp.dot(xm, wqkv_ref[...], preferred_element_type=jnp.float32)
               + bqkv_ref[...]).astype(md)                # (bt*T, 3D)

        # Per-head lane slices -> one (H*bt)-batched tensor (leading-dim reshapes only).
        q_h = [qkv[:, h * dh:(h + 1) * dh].reshape(bt, T, dh) for h in range(H)]
        k_h = [qkv[:, D + h * dh:D + (h + 1) * dh].reshape(bt, T, dh) for h in range(H)]
        v_h = [qkv[:, 2 * D + h * dh:2 * D + (h + 1) * dh].reshape(bt, T, dh)
               for h in range(H)]
        qs = jnp.stack(q_h, axis=0).reshape(H * bt, T, dh)
        ks = jnp.stack(k_h, axis=0).reshape(H * bt, T, dh)
        vs = jnp.stack(v_h, axis=0).reshape(H * bt, T, dh)

        # Batched scores / softmax / context over (H*bt).
        s = jnp.einsum('gtd,gsd->gts', qs, ks,
                       preferred_element_type=jnp.float32)        # scale pre-folded
        s = s - jnp.max(s, axis=-1, keepdims=True)
        e = jnp.exp(s)
        p = (e * pl.reciprocal(jnp.sum(e, axis=-1, keepdims=True), approx=True)).astype(md)
        ctx = jnp.einsum('gts,gsd->gtd', p, vs,
                         preferred_element_type=jnp.float32)      # (H*bt, T, dh)

        # Concatenate heads back on the lane axis, then ONE (bt*T, D) x (D, D) out-proj
        # (the head-sum happens inside the D = H*dh contraction).
        ctx = ctx.reshape(H, bt * T, dh)
        ctx_cat = jnp.concatenate([ctx[h] for h in range(H)], axis=-1).astype(md)
        attn = (jnp.dot(ctx_cat, wo_ref[...], preferred_element_type=jnp.float32)
                + bo_ref[...]).reshape(bt, T, D)

        x1 = _layer_norm(x + attn, g1_ref[...], be1_ref[...])

        # Feed-forward (relu), full-width matmuls with f32 accumulation.
        x1m = x1.reshape(bt * T, D).astype(md)
        hid = jnp.maximum(jnp.dot(x1m, w1_ref[...], preferred_element_type=jnp.float32)
                          + b1_ref[...], 0.0)
        ff = (jnp.dot(hid.astype(md), w2_ref[...], preferred_element_type=jnp.float32)
              + b2_ref[...]).reshape(bt, T, D)

        x2 = _layer_norm(x1 + ff, g2_ref[...], be2_ref[...])

        @pl.when(l < n_layers - 1)
        def _():
            o_ref[...] = x2                               # stays in VMEM for next layer

        @pl.when(l == n_layers - 1)
        def _():
            o_ref[...] = _layer_norm(x2, gf_ref[...], bf_ref[...])   # final encoder norm

    return kernel


# ----------------------------- parameter packing -----------------------------

def pack_params(params, n_heads, matmul_dtype=jnp.bfloat16):
    """Stack per-layer params on a leading L axis, concatenate WQ|WK|WV, fold the
    1/sqrt(dh) scale into the Q weights/bias, and cast matmul weights to the MXU dtype.
    All layout work happens here (XLA), once."""
    layers = params['layers']
    D = params['conv_w'].shape[0]
    dh = D // n_heads
    inv_scale = 1.0 / float(dh) ** 0.5

    def row(b):         # (N,) -> (1, N)
        return b[None, :]

    def stack(fn, name):
        return jnp.stack([fn(lp[name]) for lp in layers], axis=0)

    wqkv = jnp.stack([jnp.concatenate([lp['wq'] * inv_scale, lp['wk'], lp['wv']], axis=1)
                      for lp in layers], axis=0)                          # (L, D, 3D)
    bqkv = jnp.stack([jnp.concatenate([lp['bq'] * inv_scale, lp['bk'], lp['bv']])[None, :]
                      for lp in layers], axis=0)                          # (L, 1, 3D)

    return {
        'conv_w': jnp.transpose(params['conv_w'], (1, 0))[:, None, :],    # (7, 1, D)
        'conv_b': params['conv_b'][None, :],                              # (1, D)
        'WQKV': wqkv.astype(matmul_dtype),
        'BQKV': bqkv,
        'WO': jnp.stack([lp['wo'] for lp in layers], axis=0).astype(matmul_dtype),
        'BO': stack(row, 'bo'),
        'G1': stack(row, 'g1'), 'BE1': stack(row, 'be1'),
        'W1': jnp.stack([lp['w1'] for lp in layers], axis=0).astype(matmul_dtype),
        'B1': stack(row, 'b1'),
        'W2': jnp.stack([lp['w2'] for lp in layers], axis=0).astype(matmul_dtype),
        'B2': stack(row, 'b2'),
        'G2': stack(row, 'g2'), 'BE2': stack(row, 'be2'),
        'GF': params['norm_g'][None, :], 'BF': params['norm_b'][None, :],
    }


# ----------------------------- wrapper -----------------------------

def _default_vmem_limit():
    # 3/4 of physical VMEM: ~96 MiB on v5e/v6e (128 MiB), ~48 MiB on v7x (64 MiB).
    try:
        cap = pltpu.get_tpu_info().vmem_capacity_bytes
    except Exception:
        cap = 64 * 1024 * 1024            # conservative fallback (fits every generation)
    return min((3 * int(cap)) // 4, 100 * 1024 * 1024)


def tf_aggregation_forward(x, params, n_heads, *, matmul_dtype=jnp.bfloat16,
                           batch_tile=None, vmem_limit_bytes=None, weight_buffers=None):
    """x: (B, emb_dim, T) float32 -> (B, emb_dim, T) float32 (PyTorch NCW layout).

    batch_tile: per-grid-step batch size.  Default (None) = whole batch (nb=1): best on
      single-TensorCore chips (v5e/v6e) since the stacked layer weights then stream from
      HBM exactly once.  On v7x pass batch_tile=B//2 (nb>=2) so the "parallel" batch axis
      shards across both TensorCores.
    weight_buffers: optional pipeline depth (e.g. 3) for the big per-layer weight streams
      (WQKV/WO/W1/W2) if xprof shows the weight DMA exposed (small bt / large ff_dim)."""
    B, D, T = x.shape
    L = len(params['layers'])
    F = params['layers'][0]['w1'].shape[-1]
    bt = B if batch_tile is None else batch_tile
    assert B % bt == 0
    nb = B // bt
    Tp = T + T_PAD
    if vmem_limit_bytes is None:
        vmem_limit_bytes = _default_vmem_limit()

    packed = pack_params(params, n_heads, matmul_dtype)

    # Layout work in XLA: NCW -> NWC (D on the lane axis) + zero-pad T for the conv.
    x_nwc = jnp.transpose(x, (0, 2, 1))                                   # (B, T, D)
    xp = jnp.pad(x_nwc, ((0, 0), (CONV_PAD, T_PAD - CONV_PAD), (0, 0)))   # (B, T+8, D)

    # ---- kernel 1: depthwise conv positional embedding (+ residual, + bias) ----
    h0 = pl.pallas_call(
        conv_pos_kernel,
        out_shape=jax.ShapeDtypeStruct((B, T, D), jnp.float32),
        grid=(nb,),
        in_specs=[pl.BlockSpec((bt, Tp, D), lambda b: (b, 0, 0)),
                  pl.BlockSpec((CONV_K, 1, D), lambda b: (0, 0, 0)),
                  pl.BlockSpec((1, D), lambda b: (0, 0))],
        out_specs=pl.BlockSpec((bt, T, D), lambda b: (b, 0, 0)),
        compiler_params=pltpu.CompilerParams(dimension_semantics=("parallel",)),
    )(xp, packed['conv_w'], packed['conv_b'])

    # ---- kernel 2: fused transformer encoder (all layers + final norm) ----
    def w_spec(shape, buffers=None):
        # Stacked (L, ...) tensor: streamed / double-buffered along the layer axis.
        imap = lambda b, l: (l,) + (0,) * len(shape)
        if buffers is None:
            return pl.BlockSpec((None,) + shape, imap)
        return pl.BlockSpec((None,) + shape, imap, pipeline_mode=pl.Buffered(buffers))

    def c_spec(shape):   # constant tensor, resident for the whole grid
        return pl.BlockSpec(shape, lambda b, l: (0,) * len(shape))

    in_specs = [
        pl.BlockSpec((bt, T, D), lambda b, l: (b, 0, 0)),     # layer-0 input (resident over l)
        w_spec((D, 3 * D), weight_buffers), w_spec((1, 3 * D)),   # WQKV, BQKV
        w_spec((D, D), weight_buffers), w_spec((1, D)),           # WO, bo
        w_spec((1, D)), w_spec((1, D)),                           # LN1 gamma / beta
        w_spec((D, F), weight_buffers), w_spec((1, F)),           # W1, b1
        w_spec((F, D), weight_buffers), w_spec((1, D)),           # W2, b2
        w_spec((1, D)), w_spec((1, D)),                           # LN2 gamma / beta
        c_spec((1, D)), c_spec((1, D)),                           # final norm gamma / beta
    ]
    out_spec = pl.BlockSpec((bt, T, D), lambda b, l: (b, 0, 0))

    out_nwc = pl.pallas_call(
        make_encoder_kernel(n_heads, matmul_dtype),
        out_shape=jax.ShapeDtypeStruct((B, T, D), jnp.float32),
        grid=(nb, L),
        in_specs=in_specs,
        out_specs=out_spec,
        compiler_params=pltpu.CompilerParams(
            dimension_semantics=("parallel", "arbitrary"),
            vmem_limit_bytes=vmem_limit_bytes),
    )(h0, packed['WQKV'], packed['BQKV'], packed['WO'], packed['BO'],
      packed['G1'], packed['BE1'],
      packed['W1'], packed['B1'], packed['W2'], packed['B2'],
      packed['G2'], packed['BE2'],
      packed['GF'], packed['BF'])

    return jnp.transpose(out_nwc, (0, 2, 1))                  # back to (B, D, T)


# ----------------------------- synthetic parameters -----------------------------

def init_params(key, D, F, L):
    def nrm(k, shape, scale=0.05):
        return scale * jax.random.normal(k, shape, jnp.float32)

    keys = iter(jax.random.split(key, 4 + 16 * L))
    params = {'conv_w': nrm(next(keys), (D, 7)),      # Conv1d(D, D, k=7, groups=D) squeezed
              'conv_b': nrm(next(keys), (D,))}
    layers = []
    for _ in range(L):
        layers.append(dict(
            wq=nrm(next(keys), (D, D)), wk=nrm(next(keys), (D, D)), wv=nrm(next(keys), (D, D)),
            bq=nrm(next(keys), (D,)), bk=nrm(next(keys), (D,)), bv=nrm(next(keys), (D,)),
            wo=nrm(next(keys), (D, D)), bo=nrm(next(keys), (D,)),
            g1=1.0 + nrm(next(keys), (D,), 0.01), be1=nrm(next(keys), (D,), 0.01),
            w1=nrm(next(keys), (D, F)), b1=nrm(next(keys), (F,)),
            w2=nrm(next(keys), (F, D)), b2=nrm(next(keys), (D,)),
            g2=1.0 + nrm(next(keys), (D,), 0.01), be2=nrm(next(keys), (D,), 0.01)))
    params['layers'] = layers
    params['norm_g'] = 1.0 + nrm(next(keys), (D,), 0.01)
    params['norm_b'] = nrm(next(keys), (D,), 0.01)
    return params


# ----------------------------- pure-JAX reference -----------------------------

def reference_forward(x, params, n_heads, matmul_dtype=jnp.float32):
    """matmul_dtype=float32 -> PyTorch-eval semantics (scale folded into WQ, equivalent);
    matmul_dtype=bfloat16 -> mirrors the kernel's MXU operand casts (f32 accumulation)."""
    B, D, T = x.shape
    dh = D // n_heads
    inv_scale = 1.0 / float(dh) ** 0.5
    md = matmul_dtype

    def mm(a, b):
        return jnp.dot(a.astype(md), b.astype(md), preferred_element_type=jnp.float32)

    def bmm(eq, a, b):
        return jnp.einsum(eq, a.astype(md), b.astype(md),
                          preferred_element_type=jnp.float32)

    cw = params['conv_w']                                    # (D, 7)
    xp = jnp.pad(x, ((0, 0), (0, 0), (3, 3)))
    y = jnp.zeros_like(x)
    for k in range(7):
        y = y + cw[:, k][None, :, None] * xp[:, :, k:k + T]
    h = jnp.transpose(x + y, (0, 2, 1)) + params['conv_b'][None, None, :]   # (B, T, D)

    for lp in params['layers']:
        h2 = h.reshape(B * T, D)
        attn = jnp.zeros_like(h)
        for hh in range(n_heads):
            sl = slice(hh * dh, (hh + 1) * dh)
            q = (mm(h2, lp['wq'][:, sl] * inv_scale) + lp['bq'][sl] * inv_scale
                 ).reshape(B, T, dh)
            k = (mm(h2, lp['wk'][:, sl]) + lp['bk'][sl]).reshape(B, T, dh)
            v = (mm(h2, lp['wv'][:, sl]) + lp['bv'][sl]).reshape(B, T, dh)
            s = bmm('btd,bsd->bts', q, k)                 # scale folded (mirrors kernel)
            p = jax.nn.softmax(s, axis=-1)
            ah = bmm('bts,bsd->btd', p, v)
            attn = attn + mm(ah.reshape(B * T, dh), lp['wo'][sl, :]).reshape(B, T, D)
        attn = attn + lp['bo']
        x1 = _layer_norm(h + attn, lp['g1'], lp['be1'])
        hid = jnp.maximum(mm(x1.reshape(B * T, D), lp['w1']) + lp['b1'], 0.0)
        ff = (mm(hid, lp['w2']) + lp['b2']).reshape(B, T, D)
        h = _layer_norm(x1 + ff, lp['g2'], lp['be2'])

    out = _layer_norm(h, params['norm_g'], params['norm_b'])
    return jnp.transpose(out, (0, 2, 1))


# ----------------------------- demo / self-test -----------------------------

if __name__ == "__main__":
    B, D, T, FF, H, L = 2, 32, 16, 64, 4, 2     # emb_dim=32, ff_dim=64, n_heads=4, n_layers=2
    key = jax.random.PRNGKey(0)
    kx, kp = jax.random.split(key)
    x = jax.random.normal(kx, (B, D, T), jnp.float32)     # (batch, emb_dim, time) — Conv1d NCW
    params = init_params(kp, D, FF, L)

    fwd = jax.jit(tf_aggregation_forward, static_argnums=(2,))
    out = jax.block_until_ready(fwd(x, params, H))
    assert out.shape == (B, D, T)

    # Tight check vs a reference that mirrors the kernel's bf16 matmul-operand casts.
    ref_bf16 = reference_forward(x, params, H, matmul_dtype=jnp.bfloat16)
    np.testing.assert_allclose(np.asarray(out), np.asarray(ref_bf16), rtol=2e-3, atol=2e-3)

    # Sanity check vs the exact f32 (PyTorch-eval) semantics.
    ref_f32 = reference_forward(x, params, H, matmul_dtype=jnp.float32)
    np.testing.assert_allclose(np.asarray(out), np.asarray(ref_f32), rtol=3e-2, atol=3e-2)

    print("KERNEL_OK")
</pallas_src>

<mosaic_0001>
module attributes {stable_mosaic.version = 11 : i64} {
  func.func @conv_pos_kernel(%arg0: i32, %arg1: memref<2x24x32xf32, #tpu.memory_space<vmem>>, %arg2: memref<7x1x32xf32, #tpu.memory_space<vmem>>, %arg3: memref<1x32xf32, #tpu.memory_space<vmem>>, %arg4: memref<2x16x32xf32, #tpu.memory_space<vmem>>) attributes {dimension_semantics = [#tpu.dimension_semantics<parallel>], iteration_bounds = array<i64: 1>, scalar_prefetch = 0 : i64, scratch_operands = 0 : i64, tpu.core_type = #tpu.core_type<tc>, window_params = [{transform_indices = @transform_0, window_bounds = array<i64: 2, 24, 32>}, {pipeline_mode = #tpu.pipeline_mode<synchronous>, transform_indices = @transform_1, window_bounds = array<i64: 7, 1, 32>}, {pipeline_mode = #tpu.pipeline_mode<synchronous>, transform_indices = @transform_2, window_bounds = array<i64: 1, 32>}, {transform_indices = @transform_3, window_bounds = array<i64: 2, 16, 32>}]} {
    %c0 = arith.constant 0 : index
    %c0_0 = arith.constant 0 : index
    %c0_1 = arith.constant 0 : index
    %0 = vector.load %arg1[%c0, %c0_0, %c0_1] : memref<2x24x32xf32, #tpu.memory_space<vmem>>, vector<2x24x32xf32>
    %1 = vector.extract_strided_slice %0 {offsets = [0, 3, 0], sizes = [2, 16, 32], strides = [1, 1, 1]} : vector<2x24x32xf32> to vector<2x16x32xf32>
    %c0_2 = arith.constant 0 : index
    %c0_3 = arith.constant 0 : index
    %2 = vector.load %arg3[%c0_2, %c0_3] : memref<1x32xf32, #tpu.memory_space<vmem>>, vector<1x32xf32>
    %3 = vector.shape_cast %2 : vector<1x32xf32> to vector<1x1x32xf32>
    %4 = vector.broadcast %3 : vector<1x1x32xf32> to vector<2x16x32xf32>
    %5 = arith.addf %1, %4 : vector<2x16x32xf32>
    %6 = vector.extract_strided_slice %0 {offsets = [0, 0, 0], sizes = [2, 16, 32], strides = [1, 1, 1]} : vector<2x24x32xf32> to vector<2x16x32xf32>
    %c0_4 = arith.constant 0 : index
    %c0_5 = arith.constant 0 : index
    %c0_6 = arith.constant 0 : index
    %7 = vector.load %arg2[%c0_4, %c0_5, %c0_6] : memref<7x1x32xf32, #tpu.memory_space<vmem>>, vector<1x1x32xf32>
    %8 = vector.shape_cast %7 : vector<1x1x32xf32> to vector<1x32xf32>
    %9 = vector.shape_cast %8 : vector<1x32xf32> to vector<1x1x32xf32>
    %10 = vector.broadcast %9 : vector<1x1x32xf32> to vector<2x16x32xf32>
    %11 = arith.mulf %6, %10 : vector<2x16x32xf32>
    %12 = arith.addf %5, %11 : vector<2x16x32xf32>
    %13 = vector.extract_strided_slice %0 {offsets = [0, 1, 0], sizes = [2, 16, 32], strides = [1, 1, 1]} : vector<2x24x32xf32> to vector<2x16x32xf32>
    %c1 = arith.constant 1 : index
    %c0_7 = arith.constant 0 : index
    %c0_8 = arith.constant 0 : index
    %14 = vector.load %arg2[%c1, %c0_7, %c0_8] : memref<7x1x32xf32, #tpu.memory_space<vmem>>, vector<1x1x32xf32>
    %15 = vector.shape_cast %14 : vector<1x1x32xf32> to vector<1x32xf32>
    %16 = vector.shape_cast %15 : vector<1x32xf32> to vector<1x1x32xf32>
    %17 = vector.broadcast %16 : vector<1x1x32xf32> to vector<2x16x32xf32>
    %18 = arith.mulf %13, %17 : vector<2x16x32xf32>
    %19 = arith.addf %12, %18 : vector<2x16x32xf32>
    %20 = vector.extract_strided_slice %0 {offsets = [0, 2, 0], sizes = [2, 16, 32], strides = [1, 1, 1]} : vector<2x24x32xf32> to vector<2x16x32xf32>
    %c2 = arith.constant 2 : index
    %c0_9 = arith.constant 0 : index
    %c0_10 = arith.constant 0 : index
    %21 = vector.load %arg2[%c2, %c0_9, %c0_10] : memref<7x1x32xf32, #tpu.memory_space<vmem>>, vector<1x1x32xf32>
    %22 = vector.shape_cast %21 : vector<1x1x32xf32> to vector<1x32xf32>
    %23 = vector.shape_cast %22 : vector<1x32xf32> to vector<1x1x32xf32>
    %24 = vector.broadcast %23 : vector<1x1x32xf32> to vector<2x16x32xf32>
    %25 = arith.mulf %20, %24 : vector<2x16x32xf32>
    %26 = arith.addf %19, %25 : vector<2x16x32xf32>
    %27 = vector.extract_strided_slice %0 {offsets = [0, 3, 0], sizes = [2, 16, 32], strides = [1, 1, 1]} : vector<2x24x32xf32> to vector<2x16x32xf32>
    %c3 = arith.constant 3 : index
    %c0_11 = arith.constant 0 : index
    %c0_12 = arith.constant 0 : index
    %28 = vector.load %arg2[%c3, %c0_11, %c0_12] : memref<7x1x32xf32, #tpu.memory_space<vmem>>, vector<1x1x32xf32>
    %29 = vector.shape_cast %28 : vector<1x1x32xf32> to vector<1x32xf32>
    %30 = vector.shape_cast %29 : vector<1x32xf32> to vector<1x1x32xf32>
    %31 = vector.broadcast %30 : vector<1x1x32xf32> to vector<2x16x32xf32>
    %32 = arith.mulf %27, %31 : vector<2x16x32xf32>
    %33 = arith.addf %26, %32 : vector<2x16x32xf32>
    %34 = vector.extract_strided_slice %0 {offsets = [0, 4, 0], sizes = [2, 16, 32], strides = [1, 1, 1]} : vector<2x24x32xf32> to vector<2x16x32xf32>
    %c4 = arith.constant 4 : index
    %c0_13 = arith.constant 0 : index
    %c0_14 = arith.constant 0 : index
    %35 = vector.load %arg2[%c4, %c0_13, %c0_14] : memref<7x1x32xf32, #tpu.memory_space<vmem>>, vector<1x1x32xf32>
    %36 = vector.shape_cast %35 : vector<1x1x32xf32> to vector<1x32xf32>
    %37 = vector.shape_cast %36 : vector<1x32xf32> to vector<1x1x32xf32>
    %38 = vector.broadcast %37 : vector<1x1x32xf32> to vector<2x16x32xf32>
    %39 = arith.mulf %34, %38 : vector<2x16x32xf32>
    %40 = arith.addf %33, %39 : vector<2x16x32xf32>
    %41 = vector.extract_strided_slice %0 {offsets = [0, 5, 0], sizes = [2, 16, 32], strides = [1, 1, 1]} : vector<2x24x32xf32> to vector<2x16x32xf32>
    %c5 = arith.constant 5 : index
    %c0_15 = arith.constant 0 : index
    %c0_16 = arith.constant 0 : index
    %42 = vector.load %arg2[%c5, %c0_15, %c0_16] : memref<7x1x32xf32, #tpu.memory_space<vmem>>, vector<1x1x32xf32>
    %43 = vector.shape_cast %42 : vector<1x1x32xf32> to vector<1x32xf32>
    %44 = vector.shape_cast %43 : vector<1x32xf32> to vector<1x1x32xf32>
    %45 = vector.broadcast %44 : vector<1x1x32xf32> to vector<2x16x32xf32>
    %46 = arith.mulf %41, %45 : vector<2x16x32xf32>
    %47 = arith.addf %40, %46 : vector<2x16x32xf32>
    %48 = vector.extract_strided_slice %0 {offsets = [0, 6, 0], sizes = [2, 16, 32], strides = [1, 1, 1]} : vector<2x24x32xf32> to vector<2x16x32xf32>
    %c6 = arith.constant 6 : index
    %c0_17 = arith.constant 0 : index
    %c0_18 = arith.constant 0 : index
    %49 = vector.load %arg2[%c6, %c0_17, %c0_18] : memref<7x1x32xf32, #tpu.memory_space<vmem>>, vector<1x1x32xf32>
    %50 = vector.shape_cast %49 : vector<1x1x32xf32> to vector<1x32xf32>
    %51 = vector.shape_cast %50 : vector<1x32xf32> to vector<1x1x32xf32>
    %52 = vector.broadcast %51 : vector<1x1x32xf32> to vector<2x16x32xf32>
    %53 = arith.mulf %48, %52 : vector<2x16x32xf32>
    %54 = arith.addf %47, %53 : vector<2x16x32xf32>
    %c0_19 = arith.constant 0 : index
    %c0_20 = arith.constant 0 : index
    %c0_21 = arith.constant 0 : index
    %55 = vector.load %arg4[%c0_19, %c0_20, %c0_21] : memref<2x16x32xf32, #tpu.memory_space<vmem>>, vector<2x16x32xf32>
    tpu.vector_store %arg4[%c0_19, %c0_20, %c0_21], %54 {strides = array<i32>} : memref<2x16x32xf32, #tpu.memory_space<vmem>>, vector<2x16x32xf32>,
    return
  }
  func.func @transform_0(%arg0: i32) -> (i32, i32, i32) {
    %c0_i32 = arith.constant 0 : i32
    %c0_i32_0 = arith.constant 0 : i32
    %c0_i32_1 = arith.constant 0 : i32
    return %arg0, %c0_i32, %c0_i32_0 : i32, i32, i32
  }
  func.func @transform_1(%arg0: i32) -> (i32, i32, i32) {
    %c0_i32 = arith.constant 0 : i32
    %c0_i32_0 = arith.constant 0 : i32
    %c0_i32_1 = arith.constant 0 : i32
    %c0_i32_2 = arith.constant 0 : i32
    return %c0_i32, %c0_i32_0, %c0_i32_1 : i32, i32, i32
  }
  func.func @transform_2(%arg0: i32) -> (i32, i32) {
    %c0_i32 = arith.constant 0 : i32
    %c0_i32_0 = arith.constant 0 : i32
    %c0_i32_1 = arith.constant 0 : i32
    return %c0_i32, %c0_i32_0 : i32, i32
  }
  func.func @transform_3(%arg0: i32) -> (i32, i32, i32) {
    %c0_i32 = arith.constant 0 : i32
    %c0_i32_0 = arith.constant 0 : i32
    %c0_i32_1 = arith.constant 0 : i32
    return %arg0, %c0_i32, %c0_i32_0 : i32, i32, i32
  }
}

module attributes {stable_mosaic.version = 11 : i64} {
  func.func @kernel(%arg0: i32, %arg1: i32, %arg2: memref<2x16x32xf32, #tpu.memory_space<vmem>>, %arg3: memref<1x32x96xbf16, #tpu.memory_space<vmem>>, %arg4: memref<1x1x96xf32, #tpu.memory_space<vmem>>, %arg5: memref<1x32x32xbf16, #tpu.memory_space<vmem>>, %arg6: memref<1x1x32xf32, #tpu.memory_space<vmem>>, %arg7: memref<1x1x32xf32, #tpu.memory_space<vmem>>, %arg8: memref<1x1x32xf32, #tpu.memory_space<vmem>>, %arg9: memref<1x32x64xbf16, #tpu.memory_space<vmem>>, %arg10: memref<1x1x64xf32, #tpu.memory_space<vmem>>, %arg11: memref<1x64x32xbf16, #tpu.memory_space<vmem>>, %arg12: memref<1x1x32xf32, #tpu.memory_space<vmem>>, %arg13: memref<1x1x32xf32, #tpu.memory_space<vmem>>, %arg14: memref<1x1x32xf32, #tpu.memory_space<vmem>>, %arg15: memref<1x32xf32, #tpu.memory_space<vmem>>, %arg16: memref<1x32xf32, #tpu.memory_space<vmem>>, %arg17: memref<2x16x32xf32, #tpu.memory_space<vmem>>) attributes {dimension_semantics = [#tpu.dimension_semantics<parallel>, #tpu.dimension_semantics<arbitrary>], iteration_bounds = array<i64: 1, 2>, scalar_prefetch = 0 : i64, scratch_operands = 0 : i64, tpu.core_type = #tpu.core_type<tc>, window_params = [{transform_indices = @transform_0, window_bounds = array<i64: 2, 16, 32>}, {transform_indices = @transform_1, window_bounds = array<i64: 1, 32, 96>}, {transform_indices = @transform_2, window_bounds = array<i64: 1, 1, 96>}, {transform_indices = @transform_3, window_bounds = array<i64: 1, 32, 32>}, {transform_indices = @transform_4, window_bounds = array<i64: 1, 1, 32>}, {transform_indices = @transform_5, window_bounds = array<i64: 1, 1, 32>}, {transform_indices = @transform_6, window_bounds = array<i64: 1, 1, 32>}, {transform_indices = @transform_7, window_bounds = array<i64: 1, 32, 64>}, {transform_indices = @transform_8, window_bounds = array<i64: 1, 1, 64>}, {transform_indices = @transform_9, window_bounds = array<i64: 1, 64, 32>}, {transform_indices = @transform_10, window_bounds = array<i64: 1, 1, 32>}, {transform_indices = @transform_11, window_bounds = array<i64: 1, 1, 32>}, {transform_indices = @transform_12, window_bounds = array<i64: 1, 1, 32>}, {pipeline_mode = #tpu.pipeline_mode<synchronous>, transform_indices = @transform_13, window_bounds = array<i64: 1, 32>}, {pipeline_mode = #tpu.pipeline_mode<synchronous>, transform_indices = @transform_14, window_bounds = array<i64: 1, 32>}, {transform_indices = @transform_15, window_bounds = array<i64: 2, 16, 32>}]} {
    %c0_i32 = arith.constant 0 : i32
    %0 = arith.cmpi eq, %arg1, %c0_i32 : i32
    %1 = arith.extui %0 : i1 to i32
    %c0_i32_0 = arith.constant 0 : i32
    %2 = arith.cmpi ne, %1, %c0_i32_0 : i32
    scf.if %2 {
      %c0_60 = arith.constant 0 : index
      %c0_61 = arith.constant 0 : index
      %c0_62 = arith.constant 0 : index
      %172 = vector.load %arg2[%c0_60, %c0_61, %c0_62] : memref<2x16x32xf32, #tpu.memory_space<vmem>>, vector<2x16x32xf32>
      %c0_63 = arith.constant 0 : index
      %c0_64 = arith.constant 0 : index
      %c0_65 = arith.constant 0 : index
      %173 = vector.load %arg17[%c0_63, %c0_64, %c0_65] : memref<2x16x32xf32, #tpu.memory_space<vmem>>, vector<2x16x32xf32>
      tpu.vector_store %arg17[%c0_63, %c0_64, %c0_65], %172 {strides = array<i32>} : memref<2x16x32xf32, #tpu.memory_space<vmem>>, vector<2x16x32xf32>,
    } else {
    }
    %c0 = arith.constant 0 : index
    %c0_1 = arith.constant 0 : index
    %c0_2 = arith.constant 0 : index
    %3 = vector.load %arg17[%c0, %c0_1, %c0_2] : memref<2x16x32xf32, #tpu.memory_space<vmem>>, vector<2x16x32xf32>
    %4 = vector.shape_cast %3 : vector<2x16x32xf32> to vector<32x32xf32>
    %5 = arith.truncf %4 : vector<32x32xf32> to vector<32x32xbf16>
    %c0_3 = arith.constant 0 : index
    %c0_4 = arith.constant 0 : index
    %c0_5 = arith.constant 0 : index
    %6 = vector.load %arg3[%c0_3, %c0_4, %c0_5] : memref<1x32x96xbf16, #tpu.memory_space<vmem>>, vector<1x32x96xbf16>
    %7 = vector.shape_cast %6 : vector<1x32x96xbf16> to vector<32x96xbf16>
    %cst = arith.constant dense<0.000000e+00> : vector<32x96xf32>
    %8 = tpu.matmul %5, %7, %cst {dimension_numbers = #tpu.dot_dimension_numbers<[1], [0], [0], [1], [0, 0, 1, 1], [], []>} : vector<32x32xbf16>, vector<32x96xbf16>, vector<32x96xf32> -> vector<32x96xf32>
    %c0_6 = arith.constant 0 : index
    %c0_7 = arith.constant 0 : index
    %c0_8 = arith.constant 0 : index
    %9 = vector.load %arg4[%c0_6, %c0_7, %c0_8] : memref<1x1x96xf32, #tpu.memory_space<vmem>>, vector<1x1x96xf32>
    %10 = vector.shape_cast %9 : vector<1x1x96xf32> to vector<1x96xf32>
    %11 = vector.broadcast %10 : vector<1x96xf32> to vector<32x96xf32>
    %12 = arith.addf %8, %11 : vector<32x96xf32>
    %13 = arith.truncf %12 : vector<32x96xf32> to vector<32x96xbf16>
    %14 = vector.extract_strided_slice %13 {offsets = [0, 0], sizes = [32, 8], strides = [1, 1]} : vector<32x96xbf16> to vector<32x8xbf16>
    %15 = vector.shape_cast %14 : vector<32x8xbf16> to vector<2x16x8xbf16>
    %16 = vector.extract_strided_slice %13 {offsets = [0, 8], sizes = [32, 8], strides = [1, 1]} : vector<32x96xbf16> to vector<32x8xbf16>
    %17 = vector.shape_cast %16 : vector<32x8xbf16> to vector<2x16x8xbf16>
    %18 = vector.extract_strided_slice %13 {offsets = [0, 16], sizes = [32, 8], strides = [1, 1]} : vector<32x96xbf16> to vector<32x8xbf16>
    %19 = vector.shape_cast %18 : vector<32x8xbf16> to vector<2x16x8xbf16>
    %20 = vector.extract_strided_slice %13 {offsets = [0, 24], sizes = [32, 8], strides = [1, 1]} : vector<32x96xbf16> to vector<32x8xbf16>
    %21 = vector.shape_cast %20 : vector<32x8xbf16> to vector<2x16x8xbf16>
    %22 = vector.extract_strided_slice %13 {offsets = [0, 32], sizes = [32, 8], strides = [1, 1]} : vector<32x96xbf16> to vector<32x8xbf16>
    %23 = vector.shape_cast %22 : vector<32x8xbf16> to vector<2x16x8xbf16>
    %24 = vector.extract_strided_slice %13 {offsets = [0, 40], sizes = [32, 8], strides = [1, 1]} : vector<32x96xbf16> to vector<32x8xbf16>
    %25 = vector.shape_cast %24 : vector<32x8xbf16> to vector<2x16x8xbf16>
    %26 = vector.extract_strided_slice %13 {offsets = [0, 48], sizes = [32, 8], strides = [1, 1]} : vector<32x96xbf16> to vector<32x8xbf16>
    %27 = vector.shape_cast %26 : vector<32x8xbf16> to vector<2x16x8xbf16>
    %28 = vector.extract_strided_slice %13 {offsets = [0, 56], sizes = [32, 8], strides = [1, 1]} : vector<32x96xbf16> to vector<32x8xbf16>
    %29 = vector.shape_cast %28 : vector<32x8xbf16> to vector<2x16x8xbf16>
    %30 = vector.extract_strided_slice %13 {offsets = [0, 64], sizes = [32, 8], strides = [1, 1]} : vector<32x96xbf16> to vector<32x8xbf16>
    %31 = vector.shape_cast %30 : vector<32x8xbf16> to vector<2x16x8xbf16>
    %32 = vector.extract_strided_slice %13 {offsets = [0, 72], sizes = [32, 8], strides = [1, 1]} : vector<32x96xbf16> to vector<32x8xbf16>
    %33 = vector.shape_cast %32 : vector<32x8xbf16> to vector<2x16x8xbf16>
    %34 = vector.extract_strided_slice %13 {offsets = [0, 80], sizes = [32, 8], strides = [1, 1]} : vector<32x96xbf16> to vector<32x8xbf16>
    %35 = vector.shape_cast %34 : vector<32x8xbf16> to vector<2x16x8xbf16>
    %36 = vector.extract_strided_slice %13 {offsets = [0, 88], sizes = [32, 8], strides = [1, 1]} : vector<32x96xbf16> to vector<32x8xbf16>
    %37 = vector.shape_cast %36 : vector<32x8xbf16> to vector<2x16x8xbf16>
    %38 = vector.shape_cast %15 : vector<2x16x8xbf16> to vector<1x2x16x8xbf16>
    %39 = vector.shape_cast %17 : vector<2x16x8xbf16> to vector<1x2x16x8xbf16>
    %40 = vector.shape_cast %19 : vector<2x16x8xbf16> to vector<1x2x16x8xbf16>
    %41 = vector.shape_cast %21 : vector<2x16x8xbf16> to vector<1x2x16x8xbf16>
    %42 = tpu.concatenate %38, %39, %40, %41 in 0 : vector<1x2x16x8xbf16>, vector<1x2x16x8xbf16>, vector<1x2x16x8xbf16>, vector<1x2x16x8xbf16> -> vector<4x2x16x8xbf16>
    %43 = vector.shape_cast %42 : vector<4x2x16x8xbf16> to vector<8x16x8xbf16>
    %44 = vector.shape_cast %23 : vector<2x16x8xbf16> to vector<1x2x16x8xbf16>
    %45 = vector.shape_cast %25 : vector<2x16x8xbf16> to vector<1x2x16x8xbf16>
    %46 = vector.shape_cast %27 : vector<2x16x8xbf16> to vector<1x2x16x8xbf16>
    %47 = vector.shape_cast %29 : vector<2x16x8xbf16> to vector<1x2x16x8xbf16>
    %48 = tpu.concatenate %44, %45, %46, %47 in 0 : vector<1x2x16x8xbf16>, vector<1x2x16x8xbf16>, vector<1x2x16x8xbf16>, vector<1x2x16x8xbf16> -> vector<4x2x16x8xbf16>
    %49 = vector.shape_cast %48 : vector<4x2x16x8xbf16> to vector<8x16x8xbf16>
    %50 = vector.shape_cast %31 : vector<2x16x8xbf16> to vector<1x2x16x8xbf16>
    %51 = vector.shape_cast %33 : vector<2x16x8xbf16> to vector<1x2x16x8xbf16>
    %52 = vector.shape_cast %35 : vector<2x16x8xbf16> to vector<1x2x16x8xbf16>
    %53 = vector.shape_cast %37 : vector<2x16x8xbf16> to vector<1x2x16x8xbf16>
    %54 = tpu.concatenate %50, %51, %52, %53 in 0 : vector<1x2x16x8xbf16>, vector<1x2x16x8xbf16>, vector<1x2x16x8xbf16>, vector<1x2x16x8xbf16> -> vector<4x2x16x8xbf16>
    %55 = vector.shape_cast %54 : vector<4x2x16x8xbf16> to vector<8x16x8xbf16>
    "tpu.trace_start"() <{level = 10 : i32, message = "gtd,gsd->gts"}> : () -> ()
    %cst_9 = arith.constant dense<0.000000e+00> : vector<8x16x16xf32>
    %56 = tpu.matmul %43, %49, %cst_9 {dimension_numbers = #tpu.dot_dimension_numbers<[2], [2], [1], [1], [0, 0, 0, 1, 1, 1], [0], [0]>} : vector<8x16x8xbf16>, vector<8x16x8xbf16>, vector<8x16x16xf32> -> vector<8x16x16xf32>
    "tpu.trace_stop"() : () -> ()
    %cst_10 = arith.constant dense<0xFF800000> : vector<8x16xf32>
    %57 = vector.multi_reduction <maximumf>, %56, %cst_10 [2] : vector<8x16x16xf32> to vector<8x16xf32>
    %58 = vector.shape_cast %57 : vector<8x16xf32> to vector<8x16x1xf32>
    %59 = vector.broadcast %58 : vector<8x16x1xf32> to vector<8x16x16xf32>
    %60 = arith.subf %56, %59 : vector<8x16x16xf32>
    %61 = math.exp %60 : vector<8x16x16xf32>
    %cst_11 = arith.constant dense<0.000000e+00> : vector<8x16xf32>
    %62 = vector.multi_reduction <add>, %61, %cst_11 [2] : vector<8x16x16xf32> to vector<8x16xf32>
    %63 = vector.shape_cast %62 : vector<8x16xf32> to vector<8x16x1xf32>
    %64 = tpu.reciprocal %63 {approx = true} : vector<8x16x1xf32> -> vector<8x16x1xf32>
    %65 = vector.broadcast %64 : vector<8x16x1xf32> to vector<8x16x16xf32>
    %66 = arith.mulf %61, %65 : vector<8x16x16xf32>
    %67 = arith.truncf %66 : vector<8x16x16xf32> to vector<8x16x16xbf16>
    "tpu.trace_start"() <{level = 10 : i32, message = "gts,gsd->gtd"}> : () -> ()
    %cst_12 = arith.constant dense<0.000000e+00> : vector<8x16x8xf32>
    %68 = tpu.matmul %67, %55, %cst_12 {dimension_numbers = #tpu.dot_dimension_numbers<[2], [1], [1], [2], [0, 0, 0, 1, 1, 2], [0], [0]>} : vector<8x16x16xbf16>, vector<8x16x8xbf16>, vector<8x16x8xf32> -> vector<8x16x8xf32>
    "tpu.trace_stop"() : () -> ()
    %69 = vector.shape_cast %68 : vector<8x16x8xf32> to vector<4x32x8xf32>
    %70 = vector.extract_strided_slice %69 {offsets = [0, 0, 0], sizes = [1, 32, 8], strides = [1, 1, 1]} : vector<4x32x8xf32> to vector<1x32x8xf32>
    %71 = vector.shape_cast %70 : vector<1x32x8xf32> to vector<32x8xf32>
    %72 = vector.extract_strided_slice %69 {offsets = [1, 0, 0], sizes = [1, 32, 8], strides = [1, 1, 1]} : vector<4x32x8xf32> to vector<1x32x8xf32>
    %73 = vector.shape_cast %72 : vector<1x32x8xf32> to vector<32x8xf32>
    %74 = vector.extract_strided_slice %69 {offsets = [2, 0, 0], sizes = [1, 32, 8], strides = [1, 1, 1]} : vector<4x32x8xf32> to vector<1x32x8xf32>
    %75 = vector.shape_cast %74 : vector<1x32x8xf32> to vector<32x8xf32>
    %76 = vector.extract_strided_slice %69 {offsets = [3, 0, 0], sizes = [1, 32, 8], strides = [1, 1, 1]} : vector<4x32x8xf32> to vector<1x32x8xf32>
    %77 = vector.shape_cast %76 : vector<1x32x8xf32> to vector<32x8xf32>
    %78 = tpu.concatenate %71, %73, %75, %77 in 1 : vector<32x8xf32>, vector<32x8xf32>, vector<32x8xf32>, vector<32x8xf32> -> vector<32x32xf32>
    %79 = arith.truncf %78 : vector<32x32xf32> to vector<32x32xbf16>
    %c0_13 = arith.constant 0 : index
    %c0_14 = arith.constant 0 : index
    %c0_15 = arith.constant 0 : index
    %80 = vector.load %arg5[%c0_13, %c0_14, %c0_15] : memref<1x32x32xbf16, #tpu.memory_space<vmem>>, vector<1x32x32xbf16>
    %81 = vector.shape_cast %80 : vector<1x32x32xbf16> to vector<32x32xbf16>
    %cst_16 = arith.constant dense<0.000000e+00> : vector<32x32xf32>
    %82 = tpu.matmul %79, %81, %cst_16 {dimension_numbers = #tpu.dot_dimension_numbers<[1], [0], [0], [1], [0, 0, 1, 1], [], []>} : vector<32x32xbf16>, vector<32x32xbf16>, vector<32x32xf32> -> vector<32x32xf32>
    %c0_17 = arith.constant 0 : index
    %c0_18 = arith.constant 0 : index
    %c0_19 = arith.constant 0 : index
    %83 = vector.load %arg6[%c0_17, %c0_18, %c0_19] : memref<1x1x32xf32, #tpu.memory_space<vmem>>, vector<1x1x32xf32>
    %84 = vector.shape_cast %83 : vector<1x1x32xf32> to vector<1x32xf32>
    %85 = vector.broadcast %84 : vector<1x32xf32> to vector<32x32xf32>
    %86 = arith.addf %82, %85 : vector<32x32xf32>
    %87 = vector.shape_cast %86 : vector<32x32xf32> to vector<2x16x32xf32>
    %88 = arith.addf %3, %87 : vector<2x16x32xf32>
    %c0_20 = arith.constant 0 : index
    %c0_21 = arith.constant 0 : index
    %c0_22 = arith.constant 0 : index
    %89 = vector.load %arg7[%c0_20, %c0_21, %c0_22] : memref<1x1x32xf32, #tpu.memory_space<vmem>>, vector<1x1x32xf32>
    %90 = vector.shape_cast %89 : vector<1x1x32xf32> to vector<1x32xf32>
    %c0_23 = arith.constant 0 : index
    %c0_24 = arith.constant 0 : index
    %c0_25 = arith.constant 0 : index
    %91 = vector.load %arg8[%c0_23, %c0_24, %c0_25] : memref<1x1x32xf32, #tpu.memory_space<vmem>>, vector<1x1x32xf32>
    %92 = vector.shape_cast %91 : vector<1x1x32xf32> to vector<1x32xf32>
    %cst_26 = arith.constant dense<0.000000e+00> : vector<2x16xf32>
    %93 = vector.multi_reduction <add>, %88, %cst_26 [2] : vector<2x16x32xf32> to vector<2x16xf32>
    %94 = vector.shape_cast %93 : vector<2x16xf32> to vector<2x16x1xf32>
    %cst_27 = arith.constant 3.200000e+01 : f32
    %95 = vector.broadcast %cst_27 : f32 to vector<2x16x1xf32>
    %96 = arith.divf %94, %95 : vector<2x16x1xf32>
    %97 = vector.broadcast %96 : vector<2x16x1xf32> to vector<2x16x32xf32>
    %98 = arith.subf %88, %97 : vector<2x16x32xf32>
    %99 = arith.mulf %98, %98 : vector<2x16x32xf32>
    %cst_28 = arith.constant dense<0.000000e+00> : vector<2x16xf32>
    %100 = vector.multi_reduction <add>, %99, %cst_28 [2] : vector<2x16x32xf32> to vector<2x16xf32>
    %101 = vector.shape_cast %100 : vector<2x16xf32> to vector<2x16x1xf32>
    %cst_29 = arith.constant 3.200000e+01 : f32
    %102 = vector.broadcast %cst_29 : f32 to vector<2x16x1xf32>
    %103 = arith.divf %101, %102 : vector<2x16x1xf32>
    %104 = vector.broadcast %96 : vector<2x16x1xf32> to vector<2x16x32xf32>
    %105 = arith.subf %88, %104 : vector<2x16x32xf32>
    %cst_30 = arith.constant 9.99999974E-6 : f32
    %106 = vector.broadcast %cst_30 : f32 to vector<2x16x1xf32>
    %107 = arith.addf %103, %106 : vector<2x16x1xf32>
    %108 = math.rsqrt %107 : vector<2x16x1xf32>
    %109 = vector.broadcast %108 : vector<2x16x1xf32> to vector<2x16x32xf32>
    %110 = arith.mulf %105, %109 : vector<2x16x32xf32>
    %111 = vector.shape_cast %90 : vector<1x32xf32> to vector<1x1x32xf32>
    %112 = vector.broadcast %111 : vector<1x1x32xf32> to vector<2x16x32xf32>
    %113 = arith.mulf %110, %112 : vector<2x16x32xf32>
    %114 = vector.shape_cast %92 : vector<1x32xf32> to vector<1x1x32xf32>
    %115 = vector.broadcast %114 : vector<1x1x32xf32> to vector<2x16x32xf32>
    %116 = arith.addf %113, %115 : vector<2x16x32xf32>
    %117 = vector.shape_cast %116 : vector<2x16x32xf32> to vector<32x32xf32>
    %118 = arith.truncf %117 : vector<32x32xf32> to vector<32x32xbf16>
    %c0_31 = arith.constant 0 : index
    %c0_32 = arith.constant 0 : index
    %c0_33 = arith.constant 0 : index
    %119 = vector.load %arg9[%c0_31, %c0_32, %c0_33] : memref<1x32x64xbf16, #tpu.memory_space<vmem>>, vector<1x32x64xbf16>
    %120 = vector.shape_cast %119 : vector<1x32x64xbf16> to vector<32x64xbf16>
    %cst_34 = arith.constant dense<0.000000e+00> : vector<32x64xf32>
    %121 = tpu.matmul %118, %120, %cst_34 {dimension_numbers = #tpu.dot_dimension_numbers<[1], [0], [0], [1], [0, 0, 1, 1], [], []>} : vector<32x32xbf16>, vector<32x64xbf16>, vector<32x64xf32> -> vector<32x64xf32>
    %c0_35 = arith.constant 0 : index
    %c0_36 = arith.constant 0 : index
    %c0_37 = arith.constant 0 : index
    %122 = vector.load %arg10[%c0_35, %c0_36, %c0_37] : memref<1x1x64xf32, #tpu.memory_space<vmem>>, vector<1x1x64xf32>
    %123 = vector.shape_cast %122 : vector<1x1x64xf32> to vector<1x64xf32>
    %124 = vector.broadcast %123 : vector<1x64xf32> to vector<32x64xf32>
    %125 = arith.addf %121, %124 : vector<32x64xf32>
    %cst_38 = arith.constant 0.000000e+00 : f32
    %126 = vector.broadcast %cst_38 : f32 to vector<32x64xf32>
    %127 = arith.maximumf %125, %126 : vector<32x64xf32>
    %128 = arith.truncf %127 : vector<32x64xf32> to vector<32x64xbf16>
    %c0_39 = arith.constant 0 : index
    %c0_40 = arith.constant 0 : index
    %c0_41 = arith.constant 0 : index
    %129 = vector.load %arg11[%c0_39, %c0_40, %c0_41] : memref<1x64x32xbf16, #tpu.memory_space<vmem>>, vector<1x64x32xbf16>
    %130 = vector.shape_cast %129 : vector<1x64x32xbf16> to vector<64x32xbf16>
    %cst_42 = arith.constant dense<0.000000e+00> : vector<32x32xf32>
    %131 = tpu.matmul %128, %130, %cst_42 {dimension_numbers = #tpu.dot_dimension_numbers<[1], [0], [0], [1], [0, 0, 1, 1], [], []>} : vector<32x64xbf16>, vector<64x32xbf16>, vector<32x32xf32> -> vector<32x32xf32>
    %c0_43 = arith.constant 0 : index
    %c0_44 = arith.constant 0 : index
    %c0_45 = arith.constant 0 : index
    %132 = vector.load %arg12[%c0_43, %c0_44, %c0_45] : memref<1x1x32xf32, #tpu.memory_space<vmem>>, vector<1x1x32xf32>
    %133 = vector.shape_cast %132 : vector<1x1x32xf32> to vector<1x32xf32>
    %134 = vector.broadcast %133 : vector<1x32xf32> to vector<32x32xf32>
    %135 = arith.addf %131, %134 : vector<32x32xf32>
    %136 = vector.shape_cast %135 : vector<32x32xf32> to vector<2x16x32xf32>
    %137 = arith.addf %116, %136 : vector<2x16x32xf32>
    %c0_46 = arith.constant 0 : index
    %c0_47 = arith.constant 0 : index
    %c0_48 = arith.constant 0 : index
    %138 = vector.load %arg13[%c0_46, %c0_47, %c0_48] : memref<1x1x32xf32, #tpu.memory_space<vmem>>, vector<1x1x32xf32>
    %139 = vector.shape_cast %138 : vector<1x1x32xf32> to vector<1x32xf32>
    %c0_49 = arith.constant 0 : index
    %c0_50 = arith.constant 0 : index
    %c0_51 = arith.constant 0 : index
    %140 = vector.load %arg14[%c0_49, %c0_50, %c0_51] : memref<1x1x32xf32, #tpu.memory_space<vmem>>, vector<1x1x32xf32>
    %141 = vector.shape_cast %140 : vector<1x1x32xf32> to vector<1x32xf32>
    %cst_52 = arith.constant dense<0.000000e+00> : vector<2x16xf32>
    %142 = vector.multi_reduction <add>, %137, %cst_52 [2] : vector<2x16x32xf32> to vector<2x16xf32>
    %143 = vector.shape_cast %142 : vector<2x16xf32> to vector<2x16x1xf32>
    %cst_53 = arith.constant 3.200000e+01 : f32
    %144 = vector.broadcast %cst_53 : f32 to vector<2x16x1xf32>
    %145 = arith.divf %143, %144 : vector<2x16x1xf32>
    %146 = vector.broadcast %145 : vector<2x16x1xf32> to vector<2x16x32xf32>
    %147 = arith.subf %137, %146 : vector<2x16x32xf32>
    %148 = arith.mulf %147, %147 : vector<2x16x32xf32>
    %cst_54 = arith.constant dense<0.000000e+00> : vector<2x16xf32>
    %149 = vector.multi_reduction <add>, %148, %cst_54 [2] : vector<2x16x32xf32> to vector<2x16xf32>
    %150 = vector.shape_cast %149 : vector<2x16xf32> to vector<2x16x1xf32>
    %cst_55 = arith.constant 3.200000e+01 : f32
    %151 = vector.broadcast %cst_55 : f32 to vector<2x16x1xf32>
    %152 = arith.divf %150, %151 : vector<2x16x1xf32>
    %153 = vector.broadcast %145 : vector<2x16x1xf32> to vector<2x16x32xf32>
    %154 = arith.subf %137, %153 : vector<2x16x32xf32>
    %cst_56 = arith.constant 9.99999974E-6 : f32
    %155 = vector.broadcast %cst_56 : f32 to vector<2x16x1xf32>
    %156 = arith.addf %152, %155 : vector<2x16x1xf32>
    %157 = math.rsqrt %156 : vector<2x16x1xf32>
    %158 = vector.broadcast %157 : vector<2x16x1xf32> to vector<2x16x32xf32>
    %159 = arith.mulf %154, %158 : vector<2x16x32xf32>
    %160 = vector.shape_cast %139 : vector<1x32xf32> to vector<1x1x32xf32>
    %161 = vector.broadcast %160 : vector<1x1x32xf32> to vector<2x16x32xf32>
    %162 = arith.mulf %159, %161 : vector<2x16x32xf32>
    %163 = vector.shape_cast %141 : vector<1x32xf32> to vector<1x1x32xf32>
    %164 = vector.broadcast %163 : vector<1x1x32xf32> to vector<2x16x32xf32>
    %165 = arith.addf %162, %164 : vector<2x16x32xf32>
    %c1_i32 = arith.constant 1 : i32
    %166 = arith.cmpi slt, %arg1, %c1_i32 : i32
    %167 = arith.extui %166 : i1 to i32
    %c0_i32_57 = arith.constant 0 : i32
    %168 = arith.cmpi ne, %167, %c0_i32_57 : i32
    scf.if %168 {
      %c0_60 = arith.constant 0 : index
      %c0_61 = arith.constant 0 : index
      %c0_62 = arith.constant 0 : index
      %172 = vector.load %arg17[%c0_60, %c0_61, %c0_62] : memref<2x16x32xf32, #tpu.memory_space<vmem>>, vector<2x16x32xf32>
      tpu.vector_store %arg17[%c0_60, %c0_61, %c0_62], %165 {strides = array<i32>} : memref<2x16x32xf32, #tpu.memory_space<vmem>>, vector<2x16x32xf32>,
    } else {
    }
    %c1_i32_58 = arith.constant 1 : i32
    %169 = arith.cmpi eq, %arg1, %c1_i32_58 : i32
    %170 = arith.extui %169 : i1 to i32
    %c0_i32_59 = arith.constant 0 : i32
    %171 = arith.cmpi ne, %170, %c0_i32_59 : i32
    scf.if %171 {
      %c0_60 = arith.constant 0 : index
      %c0_61 = arith.constant 0 : index
      %172 = vector.load %arg15[%c0_60, %c0_61] : memref<1x32xf32, #tpu.memory_space<vmem>>, vector<1x32xf32>
      %c0_62 = arith.constant 0 : index
      %c0_63 = arith.constant 0 : index
      %173 = vector.load %arg16[%c0_62, %c0_63] : memref<1x32xf32, #tpu.memory_space<vmem>>, vector<1x32xf32>
      %cst_64 = arith.constant dense<0.000000e+00> : vector<2x16xf32>
      %174 = vector.multi_reduction <add>, %165, %cst_64 [2] : vector<2x16x32xf32> to vector<2x16xf32>
      %175 = vector.shape_cast %174 : vector<2x16xf32> to vector<2x16x1xf32>
      %cst_65 = arith.constant 3.200000e+01 : f32
      %176 = vector.broadcast %cst_65 : f32 to vector<2x16x1xf32>
      %177 = arith.divf %175, %176 : vector<2x16x1xf32>
      %178 = vector.broadcast %177 : vector<2x16x1xf32> to vector<2x16x32xf32>
      %179 = arith.subf %165, %178 : vector<2x16x32xf32>
      %180 = arith.mulf %179, %179 : vector<2x16x32xf32>
      %cst_66 = arith.constant dense<0.000000e+00> : vector<2x16xf32>
      %181 = vector.multi_reduction <add>, %180, %cst_66 [2] : vector<2x16x32xf32> to vector<2x16xf32>
      %182 = vector.shape_cast %181 : vector<2x16xf32> to vector<2x16x1xf32>
      %cst_67 = arith.constant 3.200000e+01 : f32
      %183 = vector.broadcast %cst_67 : f32 to vector<2x16x1xf32>
      %184 = arith.divf %182, %183 : vector<2x16x1xf32>
      %185 = vector.broadcast %177 : vector<2x16x1xf32> to vector<2x16x32xf32>
      %186 = arith.subf %165, %185 : vector<2x16x32xf32>
      %cst_68 = arith.constant 9.99999974E-6 : f32
      %187 = vector.broadcast %cst_68 : f32 to vector<2x16x1xf32>
      %188 = arith.addf %184, %187 : vector<2x16x1xf32>
      %189 = math.rsqrt %188 : vector<2x16x1xf32>
      %190 = vector.broadcast %189 : vector<2x16x1xf32> to vector<2x16x32xf32>
      %191 = arith.mulf %186, %190 : vector<2x16x32xf32>
      %192 = vector.shape_cast %172 : vector<1x32xf32> to vector<1x1x32xf32>
      %193 = vector.broadcast %192 : vector<1x1x32xf32> to vector<2x16x32xf32>
      %194 = arith.mulf %191, %193 : vector<2x16x32xf32>
      %195 = vector.shape_cast %173 : vector<1x32xf32> to vector<1x1x32xf32>
      %196 = vector.broadcast %195 : vector<1x1x32xf32> to vector<2x16x32xf32>
      %197 = arith.addf %194, %196 : vector<2x16x32xf32>
      %c0_69 = arith.constant 0 : index
      %c0_70 = arith.constant 0 : index
      %c0_71 = arith.constant 0 : index
      %198 = vector.load %arg17[%c0_69, %c0_70, %c0_71] : memref<2x16x32xf32, #tpu.memory_space<vmem>>, vector<2x16x32xf32>
      tpu.vector_store %arg17[%c0_69, %c0_70, %c0_71], %197 {strides = array<i32>} : memref<2x16x32xf32, #tpu.memory_space<vmem>>, vector<2x16x32xf32>,
    } else {
    }
    return
  }
  func.func @transform_0(%arg0: i32, %arg1: i32) -> (i32, i32, i32) {
    %c0_i32 = arith.constant 0 : i32
    %c0_i32_0 = arith.constant 0 : i32
    %c0_i32_1 = arith.constant 0 : i32
    return %arg0, %c0_i32, %c0_i32_0 : i32, i32, i32
  }
  func.func @transform_1(%arg0: i32, %arg1: i32) -> (i32, i32, i32) {
    %c0_i32 = arith.constant 0 : i32
    %c0_i32_0 = arith.constant 0 : i32
    %c0_i32_1 = arith.constant 0 : i32
    return %arg1, %c0_i32, %c0_i32_0 : i32, i32, i32
  }
  func.func @transform_2(%arg0: i32, %arg1: i32) -> (i32, i32, i32) {
    %c0_i32 = arith.constant 0 : i32
    %c0_i32_0 = arith.constant 0 : i32
    %c0_i32_1 = arith.constant 0 : i32
    return %arg1, %c0_i32, %c0_i32_0 : i32, i32, i32
  }
  func.func @transform_3(%arg0: i32, %arg1: i32) -> (i32, i32, i32) {
    %c0_i32 = arith.constant 0 : i32
    %c0_i32_0 = arith.constant 0 : i32
    %c0_i32_1 = arith.constant 0 : i32
    return %arg1, %c0_i32, %c0_i32_0 : i32, i32, i32
  }
  func.func @transform_4(%arg0: i32, %arg1: i32) -> (i32, i32, i32) {
    %c0_i32 = arith.constant 0 : i32
    %c0_i32_0 = arith.constant 0 : i32
    %c0_i32_1 = arith.constant 0 : i32
    return %arg1, %c0_i32, %c0_i32_0 : i32, i32, i32
  }
  func.func @transform_5(%arg0: i32, %arg1: i32) -> (i32, i32, i32) {
    %c0_i32 = arith.constant 0 : i32
    %c0_i32_0 = arith.constant 0 : i32
    %c0_i32_1 = arith.constant 0 : i32
    return %arg1, %c0_i32, %c0_i32_0 : i32, i32, i32
  }
  func.func @transform_6(%arg0: i32, %arg1: i32) -> (i32, i32, i32) {
    %c0_i32 = arith.constant 0 : i32
    %c0_i32_0 = arith.constant 0 : i32
    %c0_i32_1 = arith.constant 0 : i32
    return %arg1, %c0_i32, %c0_i32_0 : i32, i32, i32
  }
  func.func @transform_7(%arg0: i32, %arg1: i32) -> (i32, i32, i32) {
    %c0_i32 = arith.constant 0 : i32
    %c0_i32_0 = arith.constant 0 : i32
    %c0_i32_1 = arith.constant 0 : i32
    return %arg1, %c0_i32, %c0_i32_0 : i32, i32, i32
  }
  func.func @transform_8(%arg0: i32, %arg1: i32) -> (i32, i32, i32) {
    %c0_i32 = arith.constant 0 : i32
    %c0_i32_0 = arith.constant 0 : i32
    %c0_i32_1 = arith.constant 0 : i32
    return %arg1, %c0_i32, %c0_i32_0 : i32, i32, i32
  }
  func.func @transform_9(%arg0: i32, %arg1: i32) -> (i32, i32, i32) {
    %c0_i32 = arith.constant 0 : i32
    %c0_i32_0 = arith.constant 0 : i32
    %c0_i32_1 = arith.constant 0 : i32
    return %arg1, %c0_i32, %c0_i32_0 : i32, i32, i32
  }
  func.func @transform_10(%arg0: i32, %arg1: i32) -> (i32, i32, i32) {
    %c0_i32 = arith.constant 0 : i32
    %c0_i32_0 = arith.constant 0 : i32
    %c0_i32_1 = arith.constant 0 : i32
    return %arg1, %c0_i32, %c0_i32_0 : i32, i32, i32
  }
  func.func @transform_11(%arg0: i32, %arg1: i32) -> (i32, i32, i32) {
    %c0_i32 = arith.constant 0 : i32
    %c0_i32_0 = arith.constant 0 : i32
    %c0_i32_1 = arith.constant 0 : i32
    return %arg1, %c0_i32, %c0_i32_0 : i32, i32, i32
  }
  func.func @transform_12(%arg0: i32, %arg1: i32) -> (i32, i32, i32) {
    %c0_i32 = arith.constant 0 : i32
    %c0_i32_0 = arith.constant 0 : i32
    %c0_i32_1 = arith.constant 0 : i32
    return %arg1, %c0_i32, %c0_i32_0 : i32, i32, i32
  }
  func.func @transform_13(%arg0: i32, %arg1: i32) -> (i32, i32) {
    %c0_i32 = arith.constant 0 : i32
    %c0_i32_0 = arith.constant 0 : i32
    %c0_i32_1 = arith.constant 0 : i32
    return %c0_i32, %c0_i32_0 : i32, i32
  }
  func.func @transform_14(%arg0: i32, %arg1: i32) -> (i32, i32) {
    %c0_i32 = arith.constant 0 : i32
    %c0_i32_0 = arith.constant 0 : i32
    %c0_i32_1 = arith.constant 0 : i32
    return %c0_i32, %c0_i32_0 : i32, i32
  }
  func.func @transform_15(%arg0: i32, %arg1: i32) -> (i32, i32, i32) {
    %c0_i32 = arith.constant 0 : i32
    %c0_i32_0 = arith.constant 0 : i32
    %c0_i32_1 = arith.constant 0 : i32
    return %arg0, %c0_i32, %c0_i32_0 : i32, i32, i32
  }
}

</mosaic_0001>

<bundles_post_ra>
// kernel: tf_aggregation_forward.2
= control target key start
LH: loop header
LB: loop body
LE: loop exit
PB: predicated region body
PF: predicated region fallthrough
CT: control target
= control target key end

     0   :  { %vm175_vm0 = vcmask 1046528   ;;  %vm42_vm1 = vcmask 1042432   ;;  %vm215_vm2 = vcmask 1045504   ;;  %vm255_vm3 = vcmask 1044480   ;;  %s494_s0 = inlined_call_operand.vmem [shape: f32[2,24,32], index: 0, kind: input, shape index: {}]   ;;  %s495_s1 = inlined_call_operand.vmem [shape: f32[7,1,32], index: 1, kind: input, shape index: {}]   ;;  %s496_s2 = inlined_call_operand.vmem [shape: f32[1,32], index: 2, kind: input, shape index: {}]   ;;  %s497_s3 = inlined_call_operand.vmem [shape: f32[2,16,32], index: 3, kind: output, shape index: {}]  }
   0x1   :  { %v14_v0 = vld [vmem:[%s494_s0] sm:$0xff]  ;;  %v15_v1 = vld [vmem:[%s494_s0 + $0x8] sm:$0xff]  ;;  %vm278_vm4 = vcmask 261123   ;;  %vm78_vm5 = vcmask 1041408   ;;  %v16_v40 = vld [vmem:[%s494_s0 + $0x10] sm:$0xff]  ;;  %vm118_vm6 = vcmask 1040384  }
   0x2   :  { %v334_v2 = vld [vmem:[%s496_s2] ss:$0 sm:$0xff]  ;;  %v344_v4 = vld [vmem:[%s495_s1 + $0x1] ss:$0 sm:$0xff]  ;;  %v351_v7 = vld [vmem:[%s495_s1 + $0x2] ss:$0 sm:$0xff] }
   0x3   :  { %v339_v3 = vld [vmem:[%s495_s1] ss:$0 sm:$0xff]  ;;  %v24_v5 = vadd.f32 %v334_v2, %v14_v0  ;;  %v356_v8 = vld [vmem:[%s495_s1 + $0x3] ss:$0 sm:$0xff]  ;;  %v66_v10 = vmul.f32 %v344_v4, %v14_v0  ;;  %v363_v11 = vld [vmem:[%s495_s1 + $0x4] ss:$0 sm:$0xff]  ;;  %v25_v12 = vadd.f32 %v334_v2, %v15_v1  ;;  %v367_v13 = vmul.f32 %v344_v4, %v15_v1 }
   0x4   :  { %v34_v6 = vmul.f32 %v339_v3, %v14_v0  ;;  %v35_v9 = vmul.f32 %v339_v3, %v15_v1  ;;  %v106_v15 = vmul.f32 %v351_v7, %v14_v0  ;;  %v146_v16 = vmul.f32 %v356_v8, %v14_v0  ;;  %v374_v17 = vld [vmem:[%s495_s1 + $0x5] ss:$0 sm:$0xff]  ;;  %v384_v22 = vld [vmem:[%s495_s1 + $0x6] ss:$0 sm:$0xff]  ;;  %v17_v62 = vld [vmem:[%s494_s0 + $0x18] sm:$0xff] }
   0x5   :  { %v377_v18 = vmul.f32 %v351_v7, %v15_v1  ;;  %v79_v19 = vrot.slane %v66_v10, 6  ;;  %v163_v20 = vmul.f32 %v363_v11, %v14_v0  ;;  %v164_v21 = vmul.f32 %v363_v11, %v15_v1 }
   0x6   :  { %v43_v14 = vrot.slane %v34_v6, 5  ;;  %v44_v23 = vrot.slane %v35_v9, 5  ;;  %v119_v25 = vrot.slane %v106_v15, 7  ;;  %v203_v26 = vmul.f32 %v374_v17, %v14_v0 }
   0x7   :  { %v204_v27 = vmul.f32 %v374_v17, %v15_v1  ;;  %v176_v28 = vrot.slane %v163_v20, 1  ;;  %v177_v29 = vrot.slane %v164_v21, 1  ;;  %v243_v30 = vmul.f32 %v384_v22, %v14_v0 }
   0x8   :  { %v55_v24 = vadd.f32 %v43_v14, %v24_v5  ;;  %v244_v31 = vmul.f32 %v384_v22, %v15_v1  ;;  %v216_v33 = vrot.slane %v203_v26, 2  ;;  %v45_v35 = vsel %vm42_vm1, %v43_v14, %v44_v23 }
   0x9   :  { %v217_v34 = vrot.slane %v204_v27, 2  ;;  %v178_v36 = vsel %vm175_vm0, %v176_v28, %v177_v29  ;;  %v56_v37 = vadd.f32 %v45_v35, %v25_v12  ;;  %v256_v39 = vrot.slane %v243_v30, 3 }
   0xa   :  { %v95_v32 = vadd.f32 %v79_v19, %v55_v24  ;;  %v80_v41 = vrot.slane %v367_v13, 6  ;;  %v257_v43 = vrot.slane %v244_v31, 3  ;;  %v120_v44 = vrot.slane %v377_v18, 7  ;;  %v18_v24 = vld [vmem:[%s494_s0 + $0x20] sm:$0xff] }
   0xb   :  { %v218_v42 = vsel %vm215_vm2, %v216_v33, %v217_v34  ;;  %v399_v45 = vmul.f32 %v363_v11, %v16_v40  ;;  %v403_v48 = vmul.f32 %v374_v17, %v16_v40  ;;  %v406_v49 = vmul.f32 %v384_v22, %v16_v40 }
   0xc   :  { %v135_v38 = vadd.f32 %v119_v25, %v95_v32  ;;  %v81_v47 = vsel %vm78_vm5, %v79_v19, %v80_v41  ;;  %v121_v51 = vsel %vm118_vm6, %v119_v25, %v120_v44  ;;  %v147_v52 = vmul.f32 %v356_v8, %v15_v1 }
   0xd   :  { %v96_v50 = vadd.f32 %v81_v47, %v56_v37  ;;  %v179_v53 = vrot.slane %v399_v45, 1  ;;  %v219_v55 = vrot.slane %v403_v48, 2  ;;  %v259_v56 = vrot.slane %v406_v49, 3 }
   0xe   :  { %v152_v46 = vadd.f32 %v146_v16, %v135_v38  ;;  %v26_v57 = vadd.f32 %v334_v2, %v16_v40  ;;  %v258_v58 = vsel %vm255_vm3, %v256_v39, %v257_v43  ;;  %v68_v60 = vmul.f32 %v344_v4, %v16_v40 }
   0xf   :  { %v136_v59 = vadd.f32 %v121_v51, %v96_v50  ;;  %v108_v61 = vmul.f32 %v351_v7, %v16_v40  ;;  %v180_v0 = vsel %vm175_vm0, %v177_v29, %v179_v53  ;;  %vm280_vm7 = vcmask 261120  }
  0x10   :  { %v192_v54 = vadd.f32 %v178_v36, %v152_v46  ;;  %v57_v1 = vadd.f32 %v44_v23, %v26_v57  ;;  %v220_v6 = vsel %vm215_vm2, %v217_v34, %v219_v55  ;;  %v82_v9 = vrot.slane %v68_v60, 6 }
  0x11   :  { %v153_v5 = vadd.f32 %v147_v52, %v136_v59  ;;  %v122_v10 = vrot.slane %v108_v61, 7  ;;  %v260_v13 = vsel %vm255_vm3, %v257_v43, %v259_v56  ;;  %v27_v14 = vadd.f32 %v334_v2, %v17_v62  ;;  %v19_v61 = vld [vmem:[%s494_s0 + $0x28] sm:$0xff] }
  0x12   :  { %v232_v63 = vadd.f32 %v218_v42, %v192_v54  ;;  %v36_v15 = vmul.f32 %v339_v3, %v17_v62  ;;  %v83_v18 = vsel %vm78_vm5, %v80_v41, %v82_v9  ;;  %v69_v20 = vmul.f32 %v344_v4, %v17_v62 }
  0x13   :  { %v193_v16 = vadd.f32 %v180_v0, %v153_v5  ;;  %v123_v19 = vsel %vm118_vm6, %v120_v44, %v122_v10  ;;  %v97_v21 = vadd.f32 %v83_v18, %v57_v1  ;;  %v148_v23 = vmul.f32 %v356_v8, %v16_v40 }
  0x14   :  { %v272_v12 = vadd.f32 %v258_v58, %v232_v63  ;;  %v46_v25 = vrot.slane %v36_v15, 5  ;;  %v109_v26 = vmul.f32 %v351_v7, %v17_v62  ;;  %v84_v28 = vrot.slane %v69_v20, 6 }
  0x15   :  { %v233_v27 = vadd.f32 %v220_v6, %v193_v16  ;;  %v166_v29 = vmul.f32 %v363_v11, %v17_v62  ;;  %v167_v30 = vmul.f32 %v363_v11, %v18_v24  ;;  %v137_v31 = vadd.f32 %v123_v19, %v97_v21 }
  0x16   :  { %279 = vst.msk [vmem:[%s497_s3 - $0x3] sm:$0xf8] %vm278_vm4, %v272_v12  ;;  %v58_v32 = vadd.f32 %v46_v25, %v27_v14  ;;  %v124_v33 = vrot.slane %v109_v26, 7  ;;  %v206_v34 = vmul.f32 %v374_v17, %v17_v62  ;;  %v207_v38 = vmul.f32 %v374_v17, %v18_v24 }
  0x17   :  { %v273_v35 = vadd.f32 %v260_v13, %v233_v27  ;;  %v181_v36 = vrot.slane %v166_v29, 1  ;;  %v182_v37 = vrot.slane %v167_v30, 1  ;;  %v154_v39 = vadd.f32 %v148_v23, %v137_v31 }
  0x18   :  { %v98_v40 = vadd.f32 %v84_v28, %v58_v32  ;;  %v149_v41 = vmul.f32 %v356_v8, %v17_v62  ;;  %v246_v42 = vmul.f32 %v384_v22, %v17_v62  ;;  %v221_v44 = vrot.slane %v206_v34, 2 }
  0x19   :  { %281 = vst.msk [vmem:[%s497_s3 + $0x5] sm:$0xff] %vm280_vm7, %v273_v35  ;;  %v183_v43 = vsel %vm175_vm0, %v181_v36, %v182_v37  ;;  %v222_v45 = vrot.slane %v207_v38, 2  ;;  %v247_v46 = vmul.f32 %v384_v22, %v18_v24  ;;  %v194_v47 = vadd.f32 %v179_v53, %v154_v39 }
  0x1a   :  { %v138_v48 = vadd.f32 %v124_v33, %v98_v40  ;;  %v28_v50 = vadd.f32 %v334_v2, %v18_v24  ;;  %v37_v51 = vmul.f32 %v339_v3, %v18_v24  ;;  %v261_v52 = vrot.slane %v246_v42, 3 }
  0x1b   :  { %v262_v54 = vrot.slane %v247_v46, 3  ;;  %v70_v57 = vmul.f32 %v344_v4, %v18_v24  ;;  %v110_v58 = vmul.f32 %v351_v7, %v18_v24  ;;  %v234_v59 = vadd.f32 %v219_v55, %v194_v47 }
  0x1c   :  { %vm282_vm8 = vcmask 256000   ;;  %v155_v60 = vadd.f32 %v149_v41, %v138_v48  ;;  %v47_v62 = vrot.slane %v37_v51, 5  ;;  %v223_v53 = vsel %vm215_vm2, %v221_v44, %v222_v45 }
  0x1d   :  { %v85_v63 = vrot.slane %v70_v57, 6  ;;  %v125_v0 = vrot.slane %v110_v58, 7  ;;  %v168_v3 = vmul.f32 %v363_v11, %v19_v61  ;;  %v274_v1 = vadd.f32 %v259_v56, %v234_v59 }
  0x1e   :  { %v195_v5 = vadd.f32 %v183_v43, %v155_v60  ;;  %v48_v6 = vsel %vm42_vm1, %v46_v25, %v47_v62  ;;  %v208_v55 = vmul.f32 %v374_v17, %v19_v61  ;;  %v263_v9 = vsel %vm255_vm3, %v261_v52, %v262_v54 }
  0x1f   :  { %v59_v10 = vadd.f32 %v48_v6, %v28_v50  ;;  %v86_v12 = vsel %vm78_vm5, %v84_v28, %v85_v63  ;;  %v126_v13 = vsel %vm118_vm6, %v124_v33, %v125_v0  ;;  %283 = vst.msk [vmem:[%s497_s3 + $0xd] sm:$0x7] %vm282_vm8, %v274_v1  ;;  %v184_v49 = vrot.slane %v168_v3, 1 }
  0x20   :  { %v235_v11 = vadd.f32 %v223_v53, %v195_v5  ;;  %v248_v56 = vmul.f32 %v384_v22, %v19_v61  ;;  %v29_v14 = vadd.f32 %v334_v2, %v19_v61  ;;  %v150_v17 = vmul.f32 %v356_v8, %v18_v24 }
  0x21   :  { %v99_v15 = vadd.f32 %v86_v12, %v59_v10  ;;  %v71_v16 = vmul.f32 %v344_v4, %v19_v61  ;;  %v111_v18 = vmul.f32 %v351_v7, %v19_v61  ;;  %v224_v20 = vrot.slane %v208_v55, 2 }
  0x22   :  { %v275_v19 = vadd.f32 %v263_v9, %v235_v11  ;;  %v60_v21 = vadd.f32 %v47_v62, %v29_v14  ;;  %v185_v2 = vsel %vm175_vm0, %v182_v37, %v184_v49  ;;  %v264_v22 = vrot.slane %v248_v56, 3 }
  0x23   :  { %v139_v23 = vadd.f32 %v126_v13, %v99_v15  ;;  %v87_v25 = vrot.slane %v71_v16, 6  ;;  %v127_v26 = vrot.slane %v111_v18, 7  ;;  %v225_v7 = vsel %vm215_vm2, %v222_v45, %v224_v20 }
  0x24   :  { %284 = vst.msk [vmem:[%s497_s3 + $0xd] sm:$0xf8] %vm278_vm4, %v275_v19  ;;  %v151_v29 = vmul.f32 %v356_v8, %v19_v61  ;;  %v265_v31 = vsel %vm255_vm3, %v262_v54, %v264_v22 }
  0x25   :  { %v156_v27 = vadd.f32 %v150_v17, %v139_v23  ;;  %v88_v24 = vsel %vm78_vm5, %v85_v63, %v87_v25  ;;  %v128_v4 = vsel %vm118_vm6, %v125_v0, %v127_v26 }
  0x26   :  { %v100_v28 = vadd.f32 %v88_v24, %v60_v21 }
  0x27   :  { %v196_v30 = vadd.f32 %v185_v2, %v156_v27 }
  0x28   :  { %v140_v32 = vadd.f32 %v128_v4, %v100_v28 }
  0x29   :  { %v236_v33 = vadd.f32 %v225_v7, %v196_v30 }
  0x2a   :  { %v157_v34 = vadd.f32 %v151_v29, %v140_v32 }
  0x2b   :  { %v276_v35 = vadd.f32 %v265_v31, %v236_v33 }
  0x2c   :  { %v197_v36 = vadd.f32 %v184_v49, %v157_v34 }
  0x2d   :  { %285 = vst.msk [vmem:[%s497_s3 + $0x15] sm:$0xff] %vm280_vm7, %v276_v35 }
  0x2e   :  { %v237_v37 = vadd.f32 %v224_v20, %v197_v36 }
  0x30   :  { %v277_v38 = vadd.f32 %v264_v22, %v237_v37 }
  0x32   :  { %286 = vst.msk [vmem:[%s497_s3 + $0x1d] sm:$0x7] %vm282_vm8, %v277_v38 }

// kernel: tf_aggregation_forward.3
= control target key start
LH: loop header
LB: loop body
LE: loop exit
PB: predicated region body
PF: predicated region fallthrough
CT: control target
= control target key end

     0   :  { %s3075_s0 = inlined_call_operand.vmem [shape: f32[2,16,32], index: 0, kind: input, shape index: {}]   ;;  %s3076_s1 = inlined_call_operand.vmem [shape: bf16[2,32,96], index: 1, kind: input, shape index: {}]   ;;  %s3077_s2 = inlined_call_operand.vmem [shape: f32[2,1,96], index: 2, kind: input, shape index: {}]   ;;  %s3078_s3 = inlined_call_operand.vmem [shape: bf16[2,32,32], index: 3, kind: input, shape index: {}]   ;;  %s3079_s4 = inlined_call_operand.vmem [shape: f32[2,1,32], index: 4, kind: input, shape index: {}]   ;;  %s3080_s5 = inlined_call_operand.vmem [shape: f32[2,1,32], index: 5, kind: input, shape index: {}]   ;;  %s3081_s6 = inlined_call_operand.vmem [shape: f32[2,1,32], index: 6, kind: input, shape index: {}]   ;;  %s3082_s7 = inlined_call_operand.vmem [shape: bf16[2,32,64], index: 7, kind: input, shape index: {}]   ;;  %s3083_s8 = inlined_call_operand.vmem [shape: f32[2,1,64], index: 8, kind: input, shape index: {}]   ;;  %s3084_s9 = inlined_call_operand.vmem [shape: bf16[2,64,32], index: 9, kind: input, shape index: {}]   ;;  %s3085_s10 = inlined_call_operand.vmem [shape: f32[2,1,32], index: 10, kind: input, shape index: {}]   ;;  %s3086_s11 = inlined_call_operand.vmem [shape: f32[2,1,32], index: 11, kind: input, shape index: {}]   ;;  %s3087_s12 = inlined_call_operand.vmem [shape: f32[2,1,32], index: 12, kind: input, shape index: {}]   ;;  %s3088_s13 = inlined_call_operand.vmem [shape: f32[1,32], index: 13, kind: input, shape index: {}]   ;;  %s3089_s14 = inlined_call_operand.vmem [shape: f32[1,32], index: 14, kind: input, shape index: {}]   ;;  %s3090_s15 = inlined_call_operand.hbm [shape: f32[2,16,32], index: 15, kind: output, shape index: {}]  }
   0x1   :  { %3094 = sst [smem:[#allocation8_spill]] %s3075_s0 }
   0x2   :  { %3095 = sst [smem:[#allocation9_spill]] %s3076_s1 }
   0x3   :  { %3096 = sst [smem:[#allocation10_spill]] %s3078_s3 }
   0x4   :  { %3097 = sst [smem:[#allocation11_spill]] %s3088_s13 }
   0x5   :  { %3098 = sst [smem:[#allocation12_spill]] %s3089_s14 }
   0x6   :  { %3099 = sst [smem:[#allocation13_spill]] %s3090_s15 }
   0x7   :  { %20 = vsyncpa [#allocation3], 0  ;;  %s2560_s18 = smov 0   ;;  %s2562_s19 = smov 0  }
   0x8   :  { %s2564_s20 = smov 0  }
   0x9 LB: > { %3100 = sst [smem:[#allocation5_spill]] %s2463_s19  ;;  %s35_s22 = sadd.s32 1, %s2463_s19  ;;  %s2467_s20 = sphi %s2564_s20, %s26_s20   ;;  %s2463_s19 = sphi %s2562_s19, %s3119_s19   ;;  %s2459_s18 = sphi %s2560_s18, %s3118_s18  }
   0xa   : > { %3101 = sst [smem:[#allocation6_spill]] %s2467_s20  ;;  %p36_p0 = scmp.ge.s32.totalorder %s35_s22, 2 }
   0xb   : > { %p2146_p1 = scmp.ge.s32.totalorder %s2467_s20, 1  ;;  %p556_p2 = scmp.lt.s32.totalorder %s2467_s20, 3 }
   0xc   : > { %s3121_s22 = smov (%p36_p0, %s35_s22), 0 }
   0xd   : > { %3102 = sst [smem:[#allocation7_spill]] %s3121_s22  ;;  %p557_p3 = pnand %p2146_p1, %p556_p2 }
   0xe   : > { %p651_p4 = scmp.lt.s32.totalorder (!%p557_p3), %s2459_s18, 1  ;;  %s3103_s1 = sld [smem:[#allocation9_spill]] (!%p557_p3) }
   0xf   : > { %560 = sbr.rel (%p557_p3) target bundleno = 2422 (0x976), region = 80  ;;  %s3104_s3 = sld [smem:[#allocation10_spill]] (!%p557_p3) }
  0x10   : > { %p2155_p5 = scmp.ne.s32.totalorder (!%p557_p3), %s2459_s18, 0 }
  0x14   : > { %s2583_s23 = scalar_select %p651_p4, %s2459_s18, 1 }
  0x15   : > { %s3105_s19 = sld [smem:[#allocation8_spill]] (!%p2155_p5) }
  0x16   : > { %s2226_s24 = sshll.u32 %s2583_s23, 4  ;;  %s688_s0 = scalar_lea.vmem %s3085_s10, %s2583_s23 }
  0x17   : > { %s655_s30 = scalar_lea.vmem %s3103_s1, %s2226_s24  ;;  %s2596_s21 = scalar_lea.vmem %s3104_s3, %s2226_s24 }
  0x18   : > { %s2613_s29 = scalar_lea.vmem %s3082_s7, %s2226_s24  ;;  %s2229_s3 = sshll.u32 %s2583_s23, 5 }
  0x19   : > { %s2623_s15 = scalar_lea.vmem %s3084_s9, %s2229_s3  ;;  %s691_s27 = scalar_lea.vmem %s3086_s11, %s2583_s23 }
  0x1a   : > { %s694_s13 = scalar_lea.vmem %s3087_s12, %s2583_s23  ;;  %700 = sbr.rel (%p2155_p5) target bundleno = 36 (0x24), region = 84 }
  0x1b   : > { %s3106_s22 = smov (!%p2155_p5), %s3105_s19 }
  0x1f   : > { %v701_v0 = vld [vmem:[%s3105_s19] sm:$0xff]  ;;  %vm705_vm0 = vcmask 261120   ;;  %v702_v1 = vld [vmem:[%s3106_s22 + $0x8] sm:$0xff]  ;;  %v703_v2 = vld [vmem:[%s3106_s22 + $0x10] sm:$0xff] }
  0x20   : > { %706 = vst.msk [vmem:[#allocation2] sm:$0xff] %vm705_vm0, %v701_v0  ;;  %v704_v3 = vld [vmem:[%s3106_s22 + $0x18] sm:$0xff] }
  0x21   : > { %707 = vst.msk [vmem:[#allocation2 + $0x8] sm:$0xff] %vm705_vm0, %v702_v1 }
  0x22   : > { %708 = vst.msk [vmem:[#allocation2 + $0x10] sm:$0xff] %vm705_vm0, %v703_v2 }
  0x23   : > { %709 = vst.msk [vmem:[#allocation2 + $0x18] sm:$0xff] %vm705_vm0, %v704_v3 }
  0x24 PF: > { %v2231_v4 = vld [vmem:[%s655_s30 + $0x8] sm:$0xff]  ;;  %v2230_v5 = vld [vmem:[%s655_s30] sm:$0xff]  ;;  %vm736_vm1 = vcmask 261120   ;;  %s3107_s24 = scalar_lea.vmem %s3077_s2, %s2583_s23  ;;  %s2469_s28 = smov 120   ;;  %vm799_vm2 = vcmask 64512   ;;  %vm995_vm3 = vcmask 130048  }
  0x25   : > { %749 = vmatpush.bf16.msra.mxu0 %v2231_v4  ;;  %2240 = vmatpush.bf16.msra.mxu1 %v2231_v4  ;;  %v2313_v12 = vld [vmem:[%s3107_s24] ss:$0 sm:$0xff]  ;;  %s2470_s16 = smov 112   ;;  %s2471_s17 = smov 104   ;;  %vm1444_vm4 = vcmask 195584  }
  0x26   : > { %s2472_s19 = smov 96   ;;  %s2473_s3 = smov 64  }
  0x27   : > { %v2650_v6 = vld [vmem:[#allocation2] sm:$0xff]  ;;  %s2474_s14 = smov 8   ;;  %s2475_s20 = smov 16  }
  0x28   : > { %v2652_v7 = vld [vmem:[#allocation2 + $0x8] sm:$0xff]  ;;  %s2476_s26 = smov 24   ;;  %s3108_s1 = scalar_lea.vmem %s3079_s4, %s2583_s23 }
  0x29   : > { %v2654_v8 = vld [vmem:[#allocation2 + $0x10] sm:$0xff]  ;;  %v714_v10 = vpack.c.bf16 %v2652_v7, %v2650_v6  ;;  %750 = vmatpush.bf16.msra.mxu0 %v2230_v5  ;;  %2241 = vmatpush.bf16.msra.mxu1 %v2230_v5  ;;  %s3109_s24 = scalar_lea.vmem %s3080_s5, %s2583_s23  ;;  %p2220_p6 = scmp.ge.s32.totalorder %s2459_s18, 1 }
  0x2a   : > { %v2656_v9 = vld [vmem:[#allocation2 + $0x18] sm:$0xff] }
  0x2b   : > { %v715_v11 = vpack.c.bf16 %v2656_v9, %v2654_v8 }
  0x2c   : > { %2164 = vmatmul.msk.bf16.vlgmr.msra.gmra.mxu0 %vm736_vm1, %v714_v10 }
  0x2d   : > { %2165 = vmatmul.msk.bf16.vlgmr.msra.gmra.mxu1 %vm736_vm1, %v715_v11 }
  0xa9   : > { %v752_v13 = vpop.f32.mrf.mxu0 }
  0xaa   : > { %v757_v14 = vpop.f32.mrf.mxu1  ;;  %v753_v15 = vadd.f32 %v2313_v12, %v752_v13 }
  0xab   : > { %v758_v16 = vadd.f32 %v2313_v12, %v757_v14 }
  0xac   : > { %v762_v17 = vpack.c.bf16 %v753_v15, %v753_v15 }
  0xad   : > { %v764_v18 = vpack.c.bf16 %v758_v16, %v758_v16 }
  0xae   : > { %778 = vrot.lane.b32.xlu1 %v762_v17, %s2470_s16  ;;  %770 = vrot.lane.b32.xlu0 %v762_v17, %s2469_s28  ;;  %v794_v29 = vunpack.c.l.b16 %v762_v17 }
  0xaf   : > { %774 = vrot.lane.b32.xlu2 %v764_v18, %s2469_s28  ;;  %v820_v25 = vunpack.c.l.b16 %v764_v18 }
  0xb1   : > { %v754_v19 = vpop.f32.mrf.mxu0 }
  0xb2   : > { %v759_v20 = vpop.f32.mrf.mxu1  ;;  %v755_v21 = vadd.f32 %v2313_v12, %v754_v19 }
  0xb3   : > { %v760_v22 = vadd.f32 %v2313_v12, %v759_v20 }
  0xb4   : > { %v763_v23 = vpack.c.bf16 %v755_v21, %v755_v21 }
  0xb5   : > { %v765_v24 = vpack.c.bf16 %v760_v22, %v760_v22 }
  0xb6   : > { %780 = vrot.lane.b32.xlu1 %v763_v23, %s2470_s16  ;;  %772 = vrot.lane.b32.xlu0 %v763_v23, %s2469_s28  ;;  %v795_v28 = vunpack.c.l.b16 %v763_v23 }
  0xb7   : > { %776 = vrot.lane.b32.xlu2 %v765_v24, %s2469_s28  ;;  %v821_v26 = vunpack.c.l.b16 %v765_v24 }
  0xb8   : > { %v796_v30 = vpack.c.b16 %v795_v28, %v794_v29 }
  0xb9   : > { %v822_v27 = vpack.c.b16 %v821_v26, %v820_v25 }
  0xbe   : > { %788 = vrot.lane.b32.xlu1 %v763_v23, %s2471_s17  ;;  %786 = vrot.lane.b32.xlu0 %v762_v17, %s2471_s17 }
  0xbf   : > { %782 = vrot.lane.b32.xlu2 %v764_v18, %s2470_s16 }
  0xc6   : > { %823 = vrot.lane.b32.xlu1 %v822_v27, %s2472_s19  ;;  %784 = vrot.lane.b32.xlu0 %v765_v24, %s2470_s16 }
  0xc7   : > { %790 = vrot.lane.b32.xlu2 %v764_v18, %s2471_s17 }
  0xce   : > { %797 = vrot.lane.b32.xlu1 %v796_v30, %s2472_s19  ;;  %792 = vrot.lane.b32.xlu0 %v765_v24, %s2471_s17  ;;  %s3110_s17 = scalar_lea.vmem %s3081_s6, %s2583_s23 }
 0x109   : > { %v775_v31 = vpop.permute.xlu2 %774 }
 0x10a   : > { %v870_v32 = vunpack.c.l.b16 %v775_v31 }
 0x111   : > { %v777_v33 = vpop.permute.xlu2 %776 }
 0x112   : > { %v871_v34 = vunpack.c.l.b16 %v777_v33 }
 0x114   : > { %v2671_v35 = vpack.c.b16 %v871_v34, %v870_v32 }
 0x116   : > { %873 = vrot.lane.b32.xlu1 %v2671_v35, %s2472_s19 }
 0x119   : > { %v783_v51 = vpop.permute.xlu2 %782 }
 0x11a   : > { %v920_v55 = vunpack.c.l.b16 %v783_v51 }
 0x120   : > { %v779_v36 = vpop.permute.xlu1 %778  ;;  %v771_v37 = vpop.permute.xlu0 %770 }
 0x121   : > { %v895_v39 = vunpack.c.l.b16 %v779_v36  ;;  %v845_v42 = vunpack.c.l.b16 %v771_v37  ;;  %v791_v58 = vpop.permute.xlu2 %790 }
 0x122   : > { %v970_v62 = vunpack.c.l.b16 %v791_v58 }
 0x128   : > { %v781_v38 = vpop.permute.xlu1 %780  ;;  %v773_v41 = vpop.permute.xlu0 %772 }
 0x129   : > { %v896_v40 = vunpack.c.l.b16 %v781_v38  ;;  %v846_v43 = vunpack.c.l.b16 %v773_v41 }
 0x12b   : > { %v897_v44 = vpack.c.b16 %v896_v40, %v895_v39  ;;  %v847_v45 = vpack.c.b16 %v846_v43, %v845_v42 }
 0x12d   : > { %898 = vrot.lane.b32.xlu0 %v897_v44, %s2472_s19  ;;  %848 = vrot.lane.b32.xlu2 %v847_v45, %s2472_s19 }
 0x130   : > { %v789_v46 = vpop.permute.xlu1 %788  ;;  %v787_v48 = vpop.permute.xlu0 %786 }
 0x131   : > { %v946_v47 = vunpack.c.l.b16 %v789_v46  ;;  %v945_v49 = vunpack.c.l.b16 %v787_v48 }
 0x133   : > { %v2677_v50 = vpack.c.b16 %v946_v47, %v945_v49 }
 0x135   : > { %948 = vrot.lane.b32.xlu2 %v2677_v50, %s2472_s19 }
 0x138   : > { %v824_v52 = vpop.permute.xlu1 %823  ;;  %v785_v53 = vpop.permute.xlu0 %784 }
 0x139   : > { %v829_v54 = vsel %vm799_vm2, %v824_v52, 0  ;;  %v921_v56 = vunpack.c.l.b16 %v785_v53 }
 0x13a   : > { %838 = vmatpush.bf16.xpose.msra.mxu2 %v829_v54 }
 0x13b   : > { %v2682_v57 = vpack.c.b16 %v921_v56, %v920_v55 }
 0x13d   : > { %1293 = vrot.lane.b32.xlu2 %v897_v44, %s2473_s3  ;;  %923 = vrot.lane.b32.xlu0 %v2682_v57, %s2472_s19 }
 0x140   : > { %v798_v59 = vpop.permute.xlu1 %797  ;;  %v793_v60 = vpop.permute.xlu0 %792 }
 0x141   : > { %2167 = vmatmul.msk.bf16.vlgmr.msra.gmra.mxu2 %vm799_vm2, %v822_v27  ;;  %v804_v61 = vsel %vm799_vm2, %v798_v59, 0  ;;  %v971_v63 = vunpack.c.l.b16 %v793_v60 }
 0x142   : > { %813 = vmatpush.bf16.xpose.msrb.mxu1 %v804_v61 }
 0x143   : > { %v2689_v0 = vpack.c.b16 %v971_v63, %v970_v62 }
 0x145   : > { %1193 = vrot.lane.b32.xlu0 %v796_v30, %s2473_s3  ;;  %973 = vrot.lane.b32.xlu1 %v2689_v0, %s2472_s19 }
 0x149   : > { %2166 = vmatmul.msk.bf16.vlgmr.msrb.gmra.mxu1 %vm799_vm2, %v796_v30 }
 0x14d   : > { %1218 = vrot.lane.b32.xlu1 %v822_v27, %s2473_s3 }
 0x155   : > { %1243 = vrot.lane.b32.xlu1 %v847_v45, %s2473_s3 }
 0x187   : > { %v849_v2 = vpop.permute.xlu2 %848 }
 0x188   : > { %v874_v1 = vpop.permute.xlu1 %873  ;;  %v854_v4 = vsel %vm799_vm2, %v849_v2, 0 }
 0x189   : > { %v879_v3 = vsel %vm799_vm2, %v874_v1, 0  ;;  %863 = vmatpush.bf16.xpose.msra.mxu3 %v854_v4 }
 0x18a   : > { %888 = vmatpush.bf16.xpose.msra.mxu1 %v879_v3 }
 0x18f   : > { %v949_v5 = vpop.permute.xlu2 %948 }
 0x190   : > { %2168 = vmatmul.msk.bf16.vlgmr.msra.gmra.mxu3 %vm799_vm2, %v847_v45  ;;  %v954_v10 = vsel %vm799_vm2, %v949_v5, 0 }
 0x191   : > { %2169 = vmatmul.msk.bf16.vlgmr.msra.gmra.mxu1 %vm799_vm2, %v2671_v35  ;;  %963 = vmatpush.bf16.xpose.msrb.mxu0 %v954_v10 }
 0x197   : > { %v1294_v17 = vpop.permute.xlu2 %1293 }
 0x198   : > { %2172 = vmatmul.msk.bf16.vlgmr.msrb.gmra.mxu0 %vm799_vm2, %v2677_v50 }
 0x19f   : > { %v899_v11 = vpop.permute.xlu0 %898 }
 0x1a0   : > { %v904_v12 = vsel %vm799_vm2, %v899_v11, 0 }
 0x1a1   : > { %913 = vmatpush.bf16.xpose.msrb.mxu2 %v904_v12 }
 0x1a8   : > { %2170 = vmatmul.msk.bf16.vlgmr.msrb.gmra.mxu2 %vm799_vm2, %v897_v44 }
 0x1af   : > { %v924_v13 = vpop.permute.xlu0 %923 }
 0x1b0   : > { %v929_v14 = vsel %vm799_vm2, %v924_v13, 0 }
 0x1b1   : > { %938 = vmatpush.bf16.xpose.msrb.mxu3 %v929_v14 }
 0x1b7   : > { %v1194_v15 = vpop.permute.xlu0 %1193  ;;  %v974_v16 = vpop.permute.xlu1 %973 }
 0x1b8   : > { %v979_v18 = vsel %vm799_vm2, %v974_v16, 0  ;;  %2171 = vmatmul.msk.bf16.vlgmr.msrb.gmra.mxu3 %vm799_vm2, %v2682_v57  ;;  %1206 = vmatpush.bf16.msra.mxu2 %v1194_v15 }
 0x1b9   : > { %988 = vmatpush.bf16.xpose.msrb.mxu1 %v979_v18 }
 0x1bc   : > { %1306 = vmatpush.bf16.msrb.mxu2 %v1294_v17 }
 0x1bf   : > { %v1219_v19 = vpop.permute.xlu1 %1218 }
 0x1c0   : > { %2173 = vmatmul.msk.bf16.vlgmr.msrb.gmra.mxu1 %vm799_vm2, %v2689_v0  ;;  %1231 = vmatpush.bf16.msra.mxu3 %v1219_v19 }
 0x1c4   : > { %v840_v23 = vpop.f32.mrf.mxu2 }
 0x1c5   : > { %v1002_v25 = vsel %vm995_vm3, %v840_v23, -inf }
 0x1c6   : > { %v815_v20 = vpop.f32.mrf.mxu1 }
 0x1c7   : > { %v996_v21 = vsel %vm995_vm3, %v815_v20, -inf  ;;  %v1244_v22 = vpop.permute.xlu1 %1243 }
 0x1c8   : > { %997 = vmax.xlane.f32.xlu2 %v996_v21  ;;  %1256 = vmatpush.bf16.msra.mxu0 %v1244_v22 }
 0x1cc   : > { %v842_v27 = vpop.f32.mrf.mxu2 }
 0x1cd   : > { %v1005_v28 = vsel %vm995_vm3, %v842_v27, -inf }
 0x1ce   : > { %v817_v24 = vpop.f32.mrf.mxu1 }
 0x1cf   : > { %v999_v26 = vsel %vm995_vm3, %v817_v24, -inf }
 0x1d0   : > { %1003 = vmax.xlane.f32.xlu2 %v1002_v25  ;;  %1000 = vmax.xlane.f32.xlu0 %v999_v26 }
 0x1d8   : > { %1006 = vmax.xlane.f32.xlu0 %v1005_v28 }
 0x20e   : > { %v2717_v29 = vpop.f32.mrf.mxu1 }
 0x20f   : > { %v1014_v30 = vsel %vm995_vm3, %v2717_v29, -inf }
 0x210   : > { %1015 = vmax.xlane.f32.xlu0 %v1014_v30 }
 0x213   : > { %v2721_v31 = vpop.f32.mrf.mxu3 }
 0x214   : > { %v1008_v32 = vsel %vm995_vm3, %v2721_v31, -inf }
 0x215   : > { %v2725_v33 = vpop.f32.mrf.mxu0  ;;  %1009 = vmax.xlane.f32.xlu1 %v1008_v32 }
 0x216   : > { %v1032_v34 = vsel %vm995_vm3, %v2725_v33, -inf  ;;  %v2737_v40 = vpop.f32.mrf.mxu1 }
 0x217   : > { %1033 = vmax.xlane.f32.xlu2 %v1032_v34  ;;  %v1017_v41 = vsel %vm995_vm3, %v2737_v40, -inf }
 0x21b   : > { %v2749_v58 = vpop.f32.mrf.mxu3 }
 0x21c   : > { %v1011_v62 = vsel %vm995_vm3, %v2749_v58, -inf }
 0x21d   : > { %v2729_v36 = vpop.f32.mrf.mxu0 }
 0x21e   : > { %v1035_v37 = vsel %vm995_vm3, %v2729_v36, -inf }
 0x21f   : > { %1036 = vmax.xlane.f32.xlu0 %v1035_v37 }
 0x22b   : > { %v2733_v38 = vpop.f32.mrf.mxu2 }
 0x22c   : > { %v1020_v39 = vsel %vm995_vm3, %v2733_v38, -inf }
 0x22d   : > { %1021 = vmax.xlane.f32.xlu1 %v1020_v39 }
 0x233   : > { %v2761_v3 = vpop.f32.mrf.mxu2 }
 0x234   : > { %v1023_v5 = vsel %vm995_vm3, %v2761_v3, -inf }
 0x235   : > { %1018 = vmax.xlane.f32.xlu1 %v1017_v41 }
 0x23b   : > { %v998_v42 = vpop.xlane.xlu2 %997  ;;  %v2763_v4 = vpop.f32.mrf.mxu3 }
 0x23c   : > { %v1044_v43 = vsub.f32 %v815_v20, %v998_v42  ;;  %v1026_v10 = vsel %vm995_vm3, %v2763_v4, -inf }
 0x23d   : > { %v2741_v45 = vpop.f32.mrf.mxu1 }
 0x23e   : > { %v1060_v44 = vmul.f32 1.442695, %v1044_v43  ;;  %v1038_v46 = vsel %vm995_vm3, %v2741_v45, -inf }
 0x23f   : > { %1039 = vmax.xlane.f32.xlu0 %v1038_v46 }
 0x240   : > { %2321 = vpow2.f32 %v1060_v44 }
 0x243   : > { %v1004_v47 = vpop.xlane.xlu2 %1003  ;;  %v1001_v48 = vpop.xlane.xlu0 %1000 }
 0x244   : > { %v1046_v49 = vsub.f32 %v840_v23, %v1004_v47  ;;  %v1045_v51 = vsub.f32 %v817_v24, %v1001_v48  ;;  %v2777_v15 = vpop.f32.mrf.mxu3 }
 0x245   : > { %v2771_v12 = vpop.f32.mrf.mxu1  ;;  %v1029_v16 = vsel %vm995_vm3, %v2777_v15, -inf }
 0x246   : > { %v2745_v52 = vpop.eup %2321  ;;  %v1064_v53 = vmul.f32 1.442695, %v1046_v49  ;;  %v1062_v54 = vmul.f32 1.442695, %v1045_v51  ;;  %v1041_v14 = vsel %vm995_vm3, %v2771_v12, -inf }
 0x247   : > { %v1092_v55 = vsel %vm995_vm3, %v2745_v52, 0.0 }
 0x248   : > { %2323 = vpow2.f32 %v1064_v53  ;;  %1093 = vadd.xlane.f32.xlu2 %v1092_v55 }
 0x249   : > { %2325 = vpow2.f32 %v1062_v54 }
 0x24b   : > { %v1007_v56 = vpop.xlane.xlu0 %1006 }
 0x24c   : > { %v1047_v60 = vsub.f32 %v842_v27, %v1007_v56 }
 0x24e   : > { %v2751_v59 = vpop.eup %2323  ;;  %v1066_v2 = vmul.f32 1.442695, %v1047_v60 }
 0x24f   : > { %v2753_v61 = vpop.eup %2325  ;;  %v1098_v63 = vsel %vm995_vm3, %v2751_v59, 0.0 }
 0x250   : > { %1012 = vmax.xlane.f32.xlu2 %v1011_v62  ;;  %1099 = vadd.xlane.f32.xlu1 %v1098_v63  ;;  %v1095_v1 = vsel %vm995_vm3, %v2753_v61, 0.0  ;;  %2327 = vpow2.f32 %v1066_v2 }
 0x251   : > { %1096 = vadd.xlane.f32.xlu0 %v1095_v1 }
 0x256   : > { %v2769_v11 = vpop.eup %2327 }
 0x257   : > { %v1101_v13 = vsel %vm995_vm3, %v2769_v11, 0.0 }
 0x258   : > { %1024 = vmax.xlane.f32.xlu2 %v1023_v5  ;;  %1027 = vmax.xlane.f32.xlu1 %v1026_v10 }
 0x260   : > { %1102 = vadd.xlane.f32.xlu2 %v1101_v13  ;;  %1042 = vmax.xlane.f32.xlu1 %v1041_v14 }
 0x265   : > { %1268 = vrot.lane.b32.xlu0 %v2671_v35, %s2473_s3 }
 0x268   : > { %1030 = vmax.xlane.f32.xlu2 %v1029_v16 }
 0x283   : > { %v1016_v17 = vpop.xlane.xlu0 %1015 }
 0x284   : > { %v1050_v18 = vsub.f32 %v2717_v29, %v1016_v17 }
 0x286   : > { %v1072_v19 = vmul.f32 1.442695, %v1050_v18 }
 0x288   : > { %2329 = vpow2.f32 %v1072_v19  ;;  %v1010_v20 = vpop.xlane.xlu1 %1009 }
 0x289   : > { %v1048_v21 = vsub.f32 %v2721_v31, %v1010_v20 }
 0x28a   : > { %v1034_v22 = vpop.xlane.xlu2 %1033 }
 0x28b   : > { %v1068_v23 = vmul.f32 1.442695, %v1048_v21  ;;  %v1056_v24 = vsub.f32 %v2725_v33, %v1034_v22 }
 0x28d   : > { %2331 = vpow2.f32 %v1068_v23  ;;  %v1084_v35 = vmul.f32 1.442695, %v1056_v24 }
 0x28e   : > { %v2786_v25 = vpop.eup %2329 }
 0x28f   : > { %v1110_v26 = vsel %vm995_vm3, %v2786_v25, 0.0  ;;  %2333 = vpow2.f32 %v1084_v35 }
 0x290   : > { %1111 = vadd.xlane.f32.xlu0 %v1110_v26 }
 0x292   : > { %v1037_v34 = vpop.xlane.xlu0 %1036 }
 0x293   : > { %v2790_v27 = vpop.eup %2331  ;;  %v1057_v42 = vsub.f32 %v2729_v36, %v1037_v34 }
 0x294   : > { %v1104_v28 = vsel %vm995_vm3, %v2790_v27, 0.0 }
 0x295   : > { %v2794_v29 = vpop.eup %2333  ;;  %1105 = vadd.xlane.f32.xlu1 %v1104_v28  ;;  %v1086_v46 = vmul.f32 1.442695, %v1057_v42 }
 0x296   : > { %v1128_v30 = vsel %vm995_vm3, %v2794_v29, 0.0 }
 0x297   : > { %1129 = vadd.xlane.f32.xlu2 %v1128_v30 }
 0x2a0   : > { %v1022_v31 = vpop.xlane.xlu1 %1021 }
 0x2a1   : > { %v1052_v32 = vsub.f32 %v2733_v38, %v1022_v31 }
 0x2a3   : > { %v1076_v33 = vmul.f32 1.442695, %v1052_v32 }
 0x2a5   : > { %2335 = vpow2.f32 %v1076_v33 }
 0x2a8   : > { %v1019_v37 = vpop.xlane.xlu1 %1018 }
 0x2a9   : > { %v1051_v39 = vsub.f32 %v2737_v40, %v1019_v37 }
 0x2ab   : > { %v2800_v41 = vpop.eup %2335  ;;  %v1074_v43 = vmul.f32 1.442695, %v1051_v39 }
 0x2ac   : > { %v1116_v44 = vsel %vm995_vm3, %v2800_v41, 0.0 }
 0x2ad   : > { %2337 = vpow2.f32 %v1074_v43  ;;  %1117 = vadd.xlane.f32.xlu1 %v1116_v44 }
 0x2ae   : > { %2339 = vpow2.f32 %v1086_v46 }
 0x2b2   : > { %v2811_v49 = vpop.xlane.xlu0 %1039 }
 0x2b3   : > { %v2805_v47 = vpop.eup %2337 }
 0x2b4   : > { %v1113_v38 = vsel %vm995_vm3, %v2805_v47, 0.0  ;;  %v2809_v48 = vpop.eup %2339 }
 0x2b5   : > { %1114 = vadd.xlane.f32.xlu2 %v1113_v38  ;;  %v1131_v36 = vsel %vm995_vm3, %v2809_v48, 0.0 }
 0x2bb   : > { %v1094_v40 = vpop.xlane.xlu2 %1093 }
 0x2bc   : > { %2341 = vrcp.f32 %v1094_v40 }
 0x2bd   : > { %1132 = vadd.xlane.f32.xlu2 %v1131_v36 }
 0x2c2   : > { %v2342_v56 = vpop.eup %2341 }
 0x2c3   : > { %v1013_v51 = vpop.xlane.xlu2 %1012  ;;  %v1100_v53 = vpop.xlane.xlu1 %1099  ;;  %v1156_v62 = vmul.f32 %v2342_v56, %v2745_v52 }
 0x2c4   : > { %v1049_v54 = vsub.f32 %v2749_v58, %v1013_v51  ;;  %v1097_v55 = vpop.xlane.xlu0 %1096 }
 0x2c5   : > { %2343 = vrcp.f32 %v1097_v55  ;;  %v1172_v5 = vpack.c.bf16 %v1156_v62, %v1156_v62 }
 0x2c6   : > { %v1070_v60 = vmul.f32 1.442695, %v1049_v54 }
 0x2c7   : > { %v1190_v19 = vunpack.c.l.b16 %v1172_v5 }
 0x2c8   : > { %2345 = vpow2.f32 %v1070_v60 }
 0x2c9   : > { %2347 = vrcp.f32 %v1100_v53 }
 0x2cb   : > { %v2344_v63 = vpop.eup %2343  ;;  %v1025_v1 = vpop.xlane.xlu2 %1024 }
 0x2cc   : > { %v1028_v2 = vpop.xlane.xlu1 %1027  ;;  %v1157_v10 = vmul.f32 %v2344_v63, %v2753_v61  ;;  %v1053_v13 = vsub.f32 %v2761_v3, %v1025_v1 }
 0x2cd   : > { %v1054_v14 = vsub.f32 %v2763_v4, %v1028_v2 }
 0x2ce   : > { %v2820_v16 = vpop.eup %2345  ;;  %v1173_v58 = vpack.c.bf16 %v1157_v10, %v1157_v10  ;;  %v1078_v17 = vmul.f32 1.442695, %v1053_v13 }
 0x2cf   : > { %v1080_v18 = vmul.f32 1.442695, %v1054_v14  ;;  %v1107_v52 = vsel %vm995_vm3, %v2820_v16, 0.0  ;;  %v2348_v22 = vpop.eup %2347 }
 0x2d0   : > { %v1191_v20 = vunpack.c.l.b16 %v1173_v58  ;;  %2349 = vpow2.f32 %v1078_v17  ;;  %1108 = vadd.xlane.f32.xlu2 %v1107_v52  ;;  %v1158_v23 = vmul.f32 %v2348_v22, %v2751_v59 }
 0x2d1   : > { %2351 = vpow2.f32 %v1080_v18 }
 0x2d2   : > { %v1192_v21 = vpack.c.b16 %v1191_v20, %v1190_v19  ;;  %v1174_v30 = vpack.c.bf16 %v1158_v23, %v1158_v23 }
 0x2d3   : > { %v1103_v61 = vpop.xlane.xlu2 %1102 }
 0x2d4   : > { %2353 = vrcp.f32 %v1103_v61  ;;  %2174 = vmatmul.msk.bf16.vlgmr.msra.gmra.mxu2 %vm995_vm3, %v1192_v21  ;;  %v1043_v32 = vpop.xlane.xlu1 %1042  ;;  %v1215_v42 = vunpack.c.l.b16 %v1174_v30 }
 0x2d5   : > { %v1059_v59 = vsub.f32 %v2771_v12, %v1043_v32 }
 0x2d6   : > { %v2825_v3 = vpop.eup %2349 }
 0x2d7   : > { %v2827_v4 = vpop.eup %2351  ;;  %v1269_v24 = vpop.permute.xlu0 %1268  ;;  %v1119_v35 = vsel %vm995_vm3, %v2825_v3, 0.0  ;;  %v1090_v46 = vmul.f32 1.442695, %v1059_v59 }
 0x2d8   : > { %1281 = vmatpush.bf16.msra.mxu1 %v1269_v24  ;;  %1120 = vadd.xlane.f32.xlu2 %v1119_v35  ;;  %v1122_v26 = vsel %vm995_vm3, %v2827_v4, 0.0 }
 0x2d9   : > { %1123 = vadd.xlane.f32.xlu1 %v1122_v26 }
 0x2da   : > { %v2354_v28 = vpop.eup %2353 }
 0x2db   : > { %v1159_v31 = vmul.f32 %v2354_v28, %v2769_v11  ;;  %v1031_v33 = vpop.xlane.xlu2 %1030 }
 0x2dc   : > { %v1055_v34 = vsub.f32 %v2777_v15, %v1031_v33  ;;  %v1058_v15 = vsub.f32 %v2741_v45, %v2811_v49 }
 0x2dd   : > { %v1175_v37 = vpack.c.bf16 %v1159_v31, %v1159_v31 }
 0x2de   : > { %v1082_v39 = vmul.f32 1.442695, %v1055_v34  ;;  %v1088_v36 = vmul.f32 1.442695, %v1058_v15 }
 0x2df   : > { %v1216_v43 = vunpack.c.l.b16 %v1175_v37 }
 0x2e0   : > { %2355 = vpow2.f32 %v1082_v39 }
 0x2e1   : > { %v1217_v44 = vpack.c.b16 %v1216_v43, %v1215_v42  ;;  %2357 = vpow2.f32 %v1090_v46 }
 0x2e2   : > { %2359 = vpow2.f32 %v1088_v36 }
 0x2e3   : > { %2175 = vmatmul.msk.bf16.vlgmr.msra.gmra.mxu3 %vm995_vm3, %v1217_v44 }
 0x2e6   : > { %v2838_v38 = vpop.eup %2355 }
 0x2e7   : > { %v1125_v11 = vsel %vm995_vm3, %v2838_v38, 0.0  ;;  %v2842_v40 = vpop.eup %2357 }
 0x2e8   : > { %1126 = vadd.xlane.f32.xlu0 %v1125_v11  ;;  %v1137_v12 = vsel %vm995_vm3, %v2842_v40, 0.0  ;;  %v2854_v51 = vpop.eup %2359 }
 0x2e9   : > { %v1134_v53 = vsel %vm995_vm3, %v2854_v51, 0.0 }
 0x2f0   : > { %1343 = vrot.lane.b32.xlu2 %v2677_v50, %s2473_s3  ;;  %1138 = vadd.xlane.f32.xlu0 %v1137_v12 }
 0x2f2   : > { %1318 = vrot.lane.b32.xlu1 %v2682_v57, %s2473_s3 }
 0x2fa   : > { %1368 = vrot.lane.b32.xlu1 %v2689_v0, %s2473_s3 }
 0x303   : > { %v1112_v54 = vpop.xlane.xlu0 %1111 }
 0x304   : > { %2361 = vrcp.f32 %v1112_v54 }
 0x308   : > { %v1106_v2 = vpop.xlane.xlu1 %1105 }
 0x30a   : > { %v1130_v50 = vpop.xlane.xlu2 %1129  ;;  %v2362_v56 = vpop.eup %2361 }
 0x30b   : > { %v1162_v57 = vmul.f32 %v2362_v56, %v2786_v25 }
 0x30d   : > { %v1178_v60 = vpack.c.bf16 %v1162_v57, %v1162_v57 }
 0x30f   : > { %v1265_v62 = vunpack.c.l.b16 %v1178_v60 }
 0x319   : > { %1135 = vadd.xlane.f32.xlu2 %v1134_v53 }
 0x320   : > { %v1118_v10 = vpop.xlane.xlu1 %1117 }
 0x328   : > { %v1115_v55 = vpop.xlane.xlu2 %1114 }
 0x329   : > { %2363 = vrcp.f32 %v1115_v55 }
 0x32a   : > { %2365 = vrcp.f32 %v1106_v2 }
 0x32f   : > { %v2364_v0 = vpop.eup %2363 }
 0x330   : > { %v1163_v45 = vmul.f32 %v2364_v0, %v2805_v47  ;;  %v1133_v5 = vpop.xlane.xlu2 %1132  ;;  %v2366_v14 = vpop.eup %2365 }
 0x331   : > { %v1160_v25 = vmul.f32 %v2366_v14, %v2790_v27 }
 0x332   : > { %v1179_v49 = vpack.c.bf16 %v1163_v45, %v1163_v45 }
 0x333   : > { %v1176_v17 = vpack.c.bf16 %v1160_v25, %v1160_v25 }
 0x334   : > { %v1266_v63 = vunpack.c.l.b16 %v1179_v49 }
 0x335   : > { %v1240_v20 = vunpack.c.l.b16 %v1176_v17 }
 0x336   : > { %v1267_v1 = vpack.c.b16 %v1266_v63, %v1265_v62 }
 0x338   : > { %2177 = vmatmul.msk.bf16.vlgmr.msra.gmra.mxu1 %vm995_vm3, %v1267_v1 }
 0x343   : > { %v1109_v13 = vpop.xlane.xlu2 %1108 }
 0x344   : > { %2367 = vrcp.f32 %v1109_v13 }
 0x345   : > { %2369 = vrcp.f32 %v1118_v10 }
 0x346   : > { %2371 = vrcp.f32 %v1133_v5 }
 0x34a   : > { %v2368_v58 = vpop.eup %2367 }
 0x34b   : > { %v1161_v47 = vmul.f32 %v2368_v58, %v2820_v16  ;;  %v1121_v18 = vpop.xlane.xlu2 %1120  ;;  %v2370_v52 = vpop.eup %2369 }
 0x34c   : > { %2373 = vrcp.f32 %v1121_v18  ;;  %v1164_v21 = vmul.f32 %v2370_v52, %v2800_v41  ;;  %v2372_v22 = vpop.eup %2371  ;;  %v1124_v26 = vpop.xlane.xlu1 %1123 }
 0x34d   : > { %v1177_v19 = vpack.c.bf16 %v1161_v47, %v1161_v47  ;;  %2375 = vrcp.f32 %v1130_v50  ;;  %v1169_v30 = vmul.f32 %v2372_v22, %v2809_v48 }
 0x34e   : > { %v1180_v35 = vpack.c.bf16 %v1164_v21, %v1164_v21  ;;  %2377 = vrcp.f32 %v1124_v26  ;;  %v2232_v26 = vld [vmem:[%s2596_s21] sm:$0xff] }
 0x34f   : > { %v1241_v61 = vunpack.c.l.b16 %v1177_v19  ;;  %v1185_v34 = vpack.c.bf16 %v1169_v30, %v1169_v30 }
 0x350   : > { %v1290_v41 = vunpack.c.l.b16 %v1180_v35 }
 0x351   : > { %v1242_v23 = vpack.c.b16 %v1241_v61, %v1240_v20  ;;  %v1341_v42 = vunpack.c.l.b16 %v1185_v34 }
 0x352   : > { %v2374_v24 = vpop.eup %2373 }
 0x353   : > { %v1165_v27 = vmul.f32 %v2374_v24, %v2825_v3  ;;  %v1344_v28 = vpop.permute.xlu2 %1343  ;;  %2176 = vmatmul.msk.bf16.vlgmr.msra.gmra.mxu0 %vm995_vm3, %v1242_v23  ;;  %v2376_v16 = vpop.eup %2375 }
 0x354   : > { %1356 = vmatpush.bf16.msrb.mxu0 %v1344_v28  ;;  %v1168_v32 = vmul.f32 %v2376_v16, %v2794_v29  ;;  %v2378_v3 = vpop.eup %2377 }
 0x355   : > { %v1181_v31 = vpack.c.bf16 %v1165_v27, %v1165_v27  ;;  %v1166_v44 = vmul.f32 %v2378_v3, %v2827_v4  ;;  %v2233_v27 = vld [vmem:[%s2596_s21 + $0x8] sm:$0xff] }
 0x356   : > { %v1184_v59 = vpack.c.bf16 %v1168_v32, %v1168_v32  ;;  %1483 = vmatpush.bf16.msra.mxu2 %v2233_v27 }
 0x357   : > { %v1291_v33 = vunpack.c.l.b16 %v1181_v31  ;;  %v1182_v11 = vpack.c.bf16 %v1166_v44, %v1166_v44  ;;  %v1208_v1 = vpop.f32.mrf.mxu2 }
 0x358   : > { %v1340_v43 = vunpack.c.l.b16 %v1184_v59 }
 0x359   : > { %v1292_v37 = vpack.c.b16 %v1291_v33, %v1290_v41  ;;  %v1315_v36 = vunpack.c.l.b16 %v1182_v11 }
 0x35a   : > { %v1342_v46 = vpack.c.b16 %v1341_v42, %v1340_v43  ;;  %1484 = vmatpush.bf16.msra.mxu2 %v2232_v26 }
 0x35b   : > { %v1127_v39 = vpop.xlane.xlu0 %1126  ;;  %2178 = vmatmul.msk.bf16.vlgmr.msrb.gmra.mxu2 %vm995_vm3, %v1292_v37 }
 0x35c   : > { %2379 = vrcp.f32 %v1127_v39 }
 0x35f   : > { %v1210_v5 = vpop.f32.mrf.mxu2 }
 0x362   : > { %v2380_v48 = vpop.eup %2379 }
 0x363   : > { %v1167_v12 = vmul.f32 %v2380_v48, %v2838_v38  ;;  %2180 = vmatmul.msk.bf16.vlgmr.msrb.gmra.mxu0 %vm995_vm3, %v1342_v46  ;;  %v1139_v55 = vpop.xlane.xlu0 %1138 }
 0x364   : > { %v1319_v29 = vpop.permute.xlu1 %1318  ;;  %2381 = vrcp.f32 %v1139_v55 }
 0x365   : > { %v1183_v15 = vpack.c.bf16 %v1167_v12, %v1167_v12  ;;  %1331 = vmatpush.bf16.msrb.mxu3 %v1319_v29 }
 0x366   : > { %v1233_v14 = vpop.f32.mrf.mxu3 }
 0x367   : > { %v1316_v53 = vunpack.c.l.b16 %v1183_v15 }
 0x369   : > { %v1317_v54 = vpack.c.b16 %v1316_v53, %v1315_v36 }
 0x36a   : > { %v2382_v56 = vpop.eup %2381 }
 0x36b   : > { %2179 = vmatmul.msk.bf16.vlgmr.msrb.gmra.mxu3 %vm995_vm3, %v1317_v54  ;;  %v1171_v57 = vmul.f32 %v2382_v56, %v2842_v40 }
 0x36c   : > { %v1369_v50 = vpop.permute.xlu1 %1368 }
 0x36d   : > { %1381 = vmatpush.bf16.msrb.mxu1 %v1369_v50  ;;  %v1187_v0 = vpack.c.bf16 %v1171_v57, %v1171_v57 }
 0x36e   : > { %v1235_v17 = vpop.f32.mrf.mxu3 }
 0x36f   : > { %v1366_v49 = vunpack.c.l.b16 %v1187_v0 }
 0x38c   : > { %v1136_v4 = vpop.xlane.xlu2 %1135 }
 0x38d   : > { %2383 = vrcp.f32 %v1136_v4 }
 0x393   : > { %v2384_v38 = vpop.eup %2383 }
 0x394   : > { %v1170_v60 = vmul.f32 %v2384_v38, %v2854_v51 }
 0x396   : > { %v1186_v45 = vpack.c.bf16 %v1170_v60, %v1170_v60 }
 0x398   : > { %v1365_v62 = vunpack.c.l.b16 %v1186_v45  ;;  %v2314_v45 = vld [vmem:[%s3108_s1] ss:$0 sm:$0xff] }
 0x39a   : > { %v1367_v63 = vpack.c.b16 %v1366_v49, %v1365_v62 }
 0x39c   : > { %2181 = vmatmul.msk.bf16.vlgmr.msrb.gmra.mxu1 %vm995_vm3, %v1367_v63 }
 0x3b5   : > { %v1283_v58 = vpop.f32.mrf.mxu1 }
 0x3bd   : > { %v1285_v19 = vpop.f32.mrf.mxu1 }
 0x3be   : > { %v2298_v21 = vpack.i.bf16 %v1285_v19, %v1283_v58 }
 0x3d0   : > { %v1258_v2 = vpop.f32.mrf.mxu0 }
 0x3d8   : > { %v1260_v10 = vpop.f32.mrf.mxu0 }
 0x3d9   : > { %v2283_v13 = vpack.i.bf16 %v1260_v10, %v1258_v2 }
 0x3db   : > { %2284 = vrot.lane.b32.xlu2 %v2283_v13, %s2474_s14 }
 0x3de   : > { %v1308_v40 = vpop.f32.mrf.mxu2 }
 0x3e0   : > { %v1358_v25 = vpop.f32.mrf.mxu0 }
 0x3e6   : > { %v1310_v51 = vpop.f32.mrf.mxu2 }
 0x3e7   : > { %v2288_v47 = vpack.i.bf16 %v1310_v51, %v1308_v40 }
 0x3e8   : > { %v1360_v18 = vpop.f32.mrf.mxu0 }
 0x3e9   : > { %v2293_v52 = vpack.i.bf16 %v1360_v18, %v1358_v25  ;;  %2289 = vrot.lane.b32.xlu1 %v2288_v47, %s2475_s20  ;;  %v2477_v18 = vmov 32.0  }
 0x3ea   : > { %2385 = vrcp.f32 %v2477_v18 }
 0x3eb   : > { %2294 = vrot.lane.b32.xlu0 %v2293_v52, %s2476_s26 }
 0x3ee   : > { %v1333_v20 = vpop.f32.mrf.mxu3 }
 0x3f1   : > { %2299 = vrot.lane.b32.xlu1 %v2298_v21, %s2474_s14 }
 0x3f6   : > { %v1335_v61 = vpop.f32.mrf.mxu3 }
 0x3f7   : > { %v2303_v22 = vpack.i.bf16 %v1335_v61, %v1333_v20 }
 0x3f9   : > { %2304 = vrot.lane.b32.xlu1 %v2303_v22, %s2475_s20  ;;  %s3111_s20 = scalar_lea.vmem %s3083_s8, %s2583_s23 }
 0x419   : > { %v1383_v23 = vpop.f32.mrf.mxu1 }
 0x421   : > { %v1385_v24 = vpop.f32.mrf.mxu1 }
 0x422   : > { %v2308_v35 = vpack.i.bf16 %v1385_v24, %v1383_v23 }
 0x424   : > { %2309 = vrot.lane.b32.xlu2 %v2308_v35, %s2476_s26 }
 0x435   : > { %v2285_v28 = vpop.permute.xlu2 %2284 }
 0x436   : > { %v2287_v16 = vunpack.i.h.bf16 %v2285_v28  ;;  %v2286_v30 = vunpack.i.l.bf16 %v2285_v28 }
 0x438   : > { %v1437_v33 = vsel %vm799_vm2, %v1210_v5, %v2287_v16  ;;  %v1436_v34 = vsel %vm799_vm2, %v1208_v1, %v2286_v30 }
 0x45b   : > { %v2290_v31 = vpop.permute.xlu1 %2289 }
 0x45c   : > { %v2292_v32 = vunpack.i.h.bf16 %v2290_v31  ;;  %v2291_v41 = vunpack.i.l.bf16 %v2290_v31 }
 0x45d   : > { %v2295_v37 = vpop.permute.xlu0 %2294 }
 0x45e   : > { %v1441_v59 = vsel %vm995_vm3, %v1437_v33, %v2292_v32  ;;  %v1440_v39 = vsel %vm995_vm3, %v1436_v34, %v2291_v41  ;;  %v2297_v3 = vunpack.i.h.bf16 %v2295_v37  ;;  %v2296_v42 = vunpack.i.l.bf16 %v2295_v37 }
 0x460   : > { %v1445_v43 = vsel %vm1444_vm4, %v1440_v39, %v2296_v42  ;;  %v1446_v44 = vsel %vm1444_vm4, %v1441_v59, %v2297_v3  ;;  %v2235_v42 = vld [vmem:[%s2613_s29 + $0x8] sm:$0xff] }
 0x461   : > { %v1449_v46 = vpack.c.bf16 %v1446_v44, %v1445_v43  ;;  %1645 = vmatpush.bf16.msra.mxu3 %v2235_v42 }
 0x463   : > { %2190 = vmatmul.msk.bf16.vlgmr.msra.gmra.mxu2 %vm736_vm1, %v1449_v46  ;;  %v2300_v48 = vpop.permute.xlu1 %2299 }
 0x464   : > { %v2302_v12 = vunpack.i.h.bf16 %v2300_v48  ;;  %v2301_v29 = vunpack.i.l.bf16 %v2300_v48  ;;  %v2234_v48 = vld [vmem:[%s2613_s29] sm:$0xff] }
 0x465   : > { %1646 = vmatpush.bf16.msra.mxu3 %v2234_v48 }
 0x466   : > { %v1439_v54 = vsel %vm799_vm2, %v1235_v17, %v2302_v12  ;;  %v1438_v50 = vsel %vm799_vm2, %v1233_v14, %v2301_v29 }
 0x46b   : > { %v2305_v11 = vpop.permute.xlu1 %2304 }
 0x46c   : > { %v2307_v15 = vunpack.i.h.bf16 %v2305_v11  ;;  %v2306_v36 = vunpack.i.l.bf16 %v2305_v11 }
 0x46e   : > { %v1442_v56 = vsel %vm995_vm3, %v1438_v50, %v2306_v36  ;;  %v1443_v57 = vsel %vm995_vm3, %v1439_v54, %v2307_v15  ;;  %vm1700_vm3 = vcmask 523264  }
 0x47e   : > { %v2310_v53 = vpop.permute.xlu2 %2309 }
 0x47f   : > { %v2312_v55 = vunpack.i.h.bf16 %v2310_v53  ;;  %v2311_v4 = vunpack.i.l.bf16 %v2310_v53 }
 0x481   : > { %v1447_v38 = vsel %vm1444_vm4, %v1442_v56, %v2311_v4  ;;  %v1448_v0 = vsel %vm1444_vm4, %v1443_v57, %v2312_v55 }
 0x482   : > { %v1450_v60 = vpack.c.bf16 %v1448_v0, %v1447_v38 }
 0x484   : > { %2191 = vmatmul.msk.bf16.gmra.mxu2 %vm736_vm1, %v1450_v60 }
 0x4e6   : > { %v1486_v49 = vpop.f32.mrf.mxu2 }
 0x4e7   : > { %v1487_v62 = vadd.f32 %v2314_v45, %v1486_v49 }
 0x4e9   : > { %v1496_v63 = vadd.f32 %v1487_v62, %v2650_v6 }
 0x4eb   : > { %v1502_v1 = vsel %vm736_vm1, %v1496_v63, 0.0 }
 0x4ec   : > { %1503 = vadd.xlane.f32.xlu1 %v1502_v1  ;;  %v2316_v1 = vld [vmem:[%s3110_s17] ss:$0 sm:$0xff] }
 0x4ee   : > { %v1488_v2 = vpop.f32.mrf.mxu2 }
 0x4ef   : > { %v1489_v5 = vadd.f32 %v2314_v45, %v1488_v2 }
 0x4f1   : > { %v1497_v10 = vadd.f32 %v1489_v5, %v2652_v7  ;;  %v2386_v7 = vpop.eup %2385 }
 0x4f2   : > { %v1515_v52 = vmul.f32 32.0, %v2386_v7  ;;  %vm1519_vm5 = vweird.f32 %v2386_v7 }
 0x4f3   : > { %v1505_v13 = vsel %vm736_vm1, %v1497_v10, 0.0 }
 0x4f4   : > { %1506 = vadd.xlane.f32.xlu0 %v1505_v13  ;;  %v1516_v19 = vsub.f32 1.0, %v1515_v52 }
 0x4f6   : > { %v1517_v20 = vmul.f32 %v2386_v7, %v1516_v19 }
 0x4f8   : > { %v1518_v21 = vadd.f32 %v2386_v7, %v1517_v20 }
 0x4fa   : > { %v2907_v61 = vsel %vm1519_vm5, %v2386_v7, %v1518_v21 }
 0x507   : > { %v1491_v14 = vpop.f32.mrf.mxu2 }
 0x508   : > { %v1492_v40 = vadd.f32 %v2314_v45, %v1491_v14 }
 0x50a   : > { %v1498_v25 = vadd.f32 %v1492_v40, %v2654_v8 }
 0x50c   : > { %v1508_v58 = vsel %vm736_vm1, %v1498_v25, 0.0 }
 0x50d   : > { %1509 = vadd.xlane.f32.xlu2 %v1508_v58 }
 0x50f   : > { %v1493_v17 = vpop.f32.mrf.mxu2 }
 0x510   : > { %v1494_v51 = vadd.f32 %v2314_v45, %v1493_v17  ;;  %v2315_v45 = vld [vmem:[%s3109_s24] ss:$0 sm:$0xff] }
 0x512   : > { %v1499_v6 = vadd.f32 %v1494_v51, %v2656_v9 }
 0x514   : > { %v1511_v47 = vsel %vm736_vm1, %v1499_v6, 0.0 }
 0x515   : > { %1512 = vadd.xlane.f32.xlu1 %v1511_v47 }
 0x55f   : > { %v1504_v8 = vpop.xlane.xlu1 %1503 }
 0x560   : > { %v1521_v22 = vmul.f32 %v2907_v61, %v1504_v8 }
 0x562   : > { %v1525_v23 = vsub.f32 %v1496_v63, %v1521_v22 }
 0x564   : > { %v1529_v24 = vmul.f32 %v1525_v23, %v1525_v23 }
 0x566   : > { %v1533_v9 = vsel %vm736_vm1, %v1529_v24, 0.0 }
 0x567   : > { %v1507_v35 = vpop.xlane.xlu0 %1506  ;;  %1534 = vadd.xlane.f32.xlu2 %v1533_v9 }
 0x568   : > { %v1522_v27 = vmul.f32 %v2907_v61, %v1507_v35 }
 0x56a   : > { %v1526_v26 = vsub.f32 %v1497_v10, %v1522_v27 }
 0x56c   : > { %v1530_v28 = vmul.f32 %v1526_v26, %v1526_v26 }
 0x56e   : > { %v1536_v16 = vsel %vm736_vm1, %v1530_v28, 0.0 }
 0x56f   : > { %1537 = vadd.xlane.f32.xlu0 %v1536_v16 }
 0x580   : > { %v1510_v30 = vpop.xlane.xlu2 %1509 }
 0x581   : > { %v1523_v31 = vmul.f32 %v2907_v61, %v1510_v30 }
 0x583   : > { %v2914_v32 = vsub.f32 %v1498_v25, %v1523_v31 }
 0x585   : > { %v1531_v41 = vmul.f32 %v2914_v32, %v2914_v32 }
 0x587   : > { %v1539_v33 = vsel %vm736_vm1, %v1531_v41, 0.0 }
 0x588   : > { %1540 = vadd.xlane.f32.xlu1 %v1539_v33  ;;  %v1513_v34 = vpop.xlane.xlu1 %1512 }
 0x589   : > { %v1524_v37 = vmul.f32 %v2907_v61, %v1513_v34 }
 0x58b   : > { %v2920_v59 = vsub.f32 %v1499_v6, %v1524_v37  ;;  %v2239_v37 = vld [vmem:[%s2623_s15 + $0x18] sm:$0xff] }
 0x58c   : > { %1711 = vmatpush.bf16.msra.mxu0 %v2239_v37 }
 0x58d   : > { %v1532_v39 = vmul.f32 %v2920_v59, %v2920_v59 }
 0x58f   : > { %v1542_v3 = vsel %vm736_vm1, %v1532_v39, 0.0  ;;  %v2238_v39 = vld [vmem:[%s2623_s15 + $0x10] sm:$0xff] }
 0x590   : > { %1543 = vadd.xlane.f32.xlu2 %v1542_v3  ;;  %1712 = vmatpush.bf16.msra.mxu0 %v2238_v39  ;;  %v2236_v3 = vld [vmem:[%s2623_s15] sm:$0xff] }
 0x5da   : > { %v1535_v43 = vpop.xlane.xlu2 %1534 }
 0x5db   : > { %v1545_v44 = vmul.f32 %v1535_v43, %v2907_v61 }
 0x5dd   : > { %v1549_v46 = vadd.f32 1e-05, %v1545_v44 }
 0x5df   : > { %2387 = vrsqrt.f32 %v1549_v46  ;;  %vm1559_vm7 = vweird.f32 %v1549_v46 }
 0x5e2   : > { %v1538_v11 = vpop.xlane.xlu0 %1537 }
 0x5e3   : > { %v1546_v12 = vmul.f32 %v1538_v11, %v2907_v61 }
 0x5e5   : > { %v2388_v29 = vpop.eup %2387  ;;  %v1550_v15 = vadd.f32 1e-05, %v1546_v12 }
 0x5e6   : > { %v1554_v36 = vmul.f32 %v2388_v29, %v1549_v46  ;;  %vm1560_vm6 = vweird.f32 %v2388_v29 }
 0x5e7   : > { %2389 = vrsqrt.f32 %v1550_v15  ;;  %vm1561_vm8 = vmor %vm1559_vm7, %vm1560_vm6  ;;  %vm1569_vm10 = vweird.f32 %v1550_v15 }
 0x5e8   : > { %v1555_v53 = vmul.f32 %v2388_v29, %v1554_v36 }
 0x5ea   : > { %v1556_v54 = vmul.f32 0.5, %v1555_v53 }
 0x5ec   : > { %v1557_v50 = vsub.f32 1.5, %v1556_v54 }
 0x5ed   : > { %v2390_v55 = vpop.eup %2389 }
 0x5ee   : > { %v1558_v4 = vmul.f32 %v2388_v29, %v1557_v50  ;;  %v1564_v56 = vmul.f32 %v2390_v55, %v1550_v15  ;;  %vm1570_vm9 = vweird.f32 %v2390_v55 }
 0x5ef   : > { %vm1571_vm11 = vmor %vm1569_vm10, %vm1570_vm9 }
 0x5f0   : > { %v1565_v57 = vmul.f32 %v2390_v55, %v1564_v56  ;;  %v1562_v38 = vsel %vm1561_vm8, %v2388_v29, %v1558_v4  ;;  %v2318_v4 = vld [vmem:[%s688_s0] ss:$0 sm:$0xff] }
 0x5f1   : > { %v1593_v49 = vmul.f32 %v1562_v38, %v1525_v23 }
 0x5f2   : > { %v1566_v0 = vmul.f32 0.5, %v1565_v57 }
 0x5f3   : > { %v1600_v2 = vmul.f32 %v2315_v45, %v1593_v49 }
 0x5f4   : > { %v1567_v60 = vsub.f32 1.5, %v1566_v0 }
 0x5f5   : > { %v2940_v40 = vadd.f32 %v2316_v1, %v1600_v2 }
 0x5f6   : > { %v1568_v62 = vmul.f32 %v2390_v55, %v1567_v60 }
 0x5f8   : > { %v1572_v63 = vsel %vm1571_vm11, %v2390_v55, %v1568_v62 }
 0x5f9   : > { %v1594_v5 = vmul.f32 %v1572_v63, %v1526_v26 }
 0x5fb   : > { %v1601_v10 = vmul.f32 %v2315_v45, %v1594_v5  ;;  %v1541_v13 = vpop.xlane.xlu1 %1540 }
 0x5fc   : > { %v1547_v14 = vmul.f32 %v1541_v13, %v2907_v61 }
 0x5fd   : > { %v2942_v25 = vadd.f32 %v2316_v1, %v1601_v10 }
 0x5fe   : > { %v1551_v58 = vadd.f32 1e-05, %v1547_v14 }
 0x5ff   : > { %v1611_v17 = vpack.c.bf16 %v2942_v25, %v2940_v40 }
 0x600   : > { %2391 = vrsqrt.f32 %v1551_v58  ;;  %vm1579_vm13 = vweird.f32 %v1551_v58 }
 0x601   : > { %2200 = vmatmul.msk.bf16.vlgmr.msra.gmra.mxu3 %vm736_vm1, %v1611_v17 }
 0x603   : > { %v1544_v51 = vpop.xlane.xlu2 %1543 }
 0x604   : > { %v1548_v6 = vmul.f32 %v1544_v51, %v2907_v61 }
 0x606   : > { %v2392_v47 = vpop.eup %2391  ;;  %v1552_v18 = vadd.f32 1e-05, %v1548_v6 }
 0x607   : > { %v1574_v7 = vmul.f32 %v2392_v47, %v1551_v58  ;;  %vm1580_vm12 = vweird.f32 %v2392_v47 }
 0x608   : > { %2393 = vrsqrt.f32 %v1552_v18  ;;  %vm1581_vm14 = vmor %vm1579_vm13, %vm1580_vm12  ;;  %vm1589_vm0 = vweird.f32 %v1552_v18 }
 0x609   : > { %v1575_v52 = vmul.f32 %v2392_v47, %v1574_v7 }
 0x60b   : > { %v1576_v19 = vmul.f32 0.5, %v1575_v52 }
 0x60d   : > { %v1577_v20 = vsub.f32 1.5, %v1576_v19 }
 0x60e   : > { %v2394_v21 = vpop.eup %2393 }
 0x60f   : > { %v1578_v8 = vmul.f32 %v2392_v47, %v1577_v20  ;;  %v1584_v22 = vmul.f32 %v2394_v21, %v1552_v18  ;;  %vm1590_vm15 = vweird.f32 %v2394_v21 }
 0x610   : > { %vm1591_vm2 = vmor %vm1589_vm0, %vm1590_vm15 }
 0x611   : > { %v1585_v23 = vmul.f32 %v2394_v21, %v1584_v22  ;;  %v1582_v24 = vsel %vm1581_vm14, %v2392_v47, %v1578_v8 }
 0x612   : > { %v1595_v27 = vmul.f32 %v1582_v24, %v2914_v32  ;;  %v2237_v32 = vld [vmem:[%s2623_s15 + $0x8] sm:$0xff] }
 0x613   : > { %v1586_v9 = vmul.f32 0.5, %v1585_v23  ;;  %1713 = vmatpush.bf16.msra.mxu0 %v2237_v32 }
 0x614   : > { %v1602_v30 = vmul.f32 %v2315_v45, %v1595_v27 }
 0x615   : > { %v1587_v35 = vsub.f32 1.5, %v1586_v9 }
 0x616   : > { %v1609_v41 = vadd.f32 %v2316_v1, %v1602_v30 }
 0x617   : > { %v1588_v26 = vmul.f32 %v2394_v21, %v1587_v35  ;;  %1714 = vmatpush.bf16.msra.mxu0 %v2236_v3 }
 0x619   : > { %v1592_v28 = vsel %vm1591_vm2, %v2394_v21, %v1588_v26 }
 0x61a   : > { %v1596_v16 = vmul.f32 %v1592_v28, %v2920_v59  ;;  %v2317_v59 = vld [vmem:[%s3111_s20] ss:$0 sm:$0xff] }
 0x61c   : > { %v1603_v31 = vmul.f32 %v2315_v45, %v1596_v16 }
 0x61e   : > { %v1610_v33 = vadd.f32 %v2316_v1, %v1603_v31 }
 0x620   : > { %v1612_v34 = vpack.c.bf16 %v1610_v33, %v1609_v41 }
 0x622   : > { %2201 = vmatmul.msk.bf16.gmra.mxu3 %vm736_vm1, %v1612_v34 }
 0x684   : > { %v1648_v42 = vpop.f32.mrf.mxu3 }
 0x685   : > { %v1649_v43 = vadd.f32 %v2317_v59, %v1648_v42 }
 0x687   : > { %v1658_v48 = vmax.f32 %v1649_v43, 0.0 }
 0x68c   : > { %v1650_v44 = vpop.f32.mrf.mxu3 }
 0x68d   : > { %v1651_v46 = vadd.f32 %v2317_v59, %v1650_v44  ;;  %v2319_v44 = vld [vmem:[%s691_s27] ss:$0 sm:$0xff] }
 0x68f   : > { %v1659_v11 = vmax.f32 %v1651_v46, 0.0 }
 0x691   : > { %v1662_v12 = vpack.c.bf16 %v1659_v11, %v1658_v48  ;;  %v2320_v11 = vld [vmem:[%s694_s13] ss:$0 sm:$0xff] }
 0x693   : > { %2218 = vmatmul.msk.bf16.vlgmr.msra.gmra.mxu0 %vm1700_vm3, %v1662_v12 }
 0x6a5   : > { %v1653_v29 = vpop.f32.mrf.mxu3 }
 0x6a6   : > { %v1654_v15 = vadd.f32 %v2317_v59, %v1653_v29 }
 0x6a8   : > { %v1660_v54 = vmax.f32 %v1654_v15, 0.0 }
 0x6ad   : > { %v1655_v36 = vpop.f32.mrf.mxu3 }
 0x6ae   : > { %v1656_v53 = vadd.f32 %v2317_v59, %v1655_v36 }
 0x6b0   : > { %v1661_v50 = vmax.f32 %v1656_v53, 0.0 }
 0x6b2   : > { %v1663_v55 = vpack.c.bf16 %v1661_v50, %v1660_v54 }
 0x6b4   : > { %2219 = vmatmul.msk.bf16.gmra.mxu0 %vm1700_vm3, %v1663_v55 }
 0x710   : > { %v1716_v56 = vpop.f32.mrf.mxu0 }
 0x711   : > { %v1717_v57 = vadd.f32 %v2318_v4, %v1716_v56 }
 0x713   : > { %v1726_v38 = vadd.f32 %v1717_v57, %v2940_v40 }
 0x715   : > { %v1732_v0 = vsel %vm736_vm1, %v1726_v38, 0.0 }
 0x716   : > { %1733 = vadd.xlane.f32.xlu0 %v1732_v0 }
 0x718   : > { %v1718_v60 = vpop.f32.mrf.mxu0 }
 0x719   : > { %v1719_v45 = vadd.f32 %v2318_v4, %v1718_v60 }
 0x71b   : > { %v1727_v49 = vadd.f32 %v1719_v45, %v2942_v25 }
 0x71d   : > { %v1735_v62 = vsel %vm736_vm1, %v1727_v49, 0.0 }
 0x71e   : > { %1736 = vadd.xlane.f32.xlu1 %v1735_v62 }
 0x731   : > { %v1721_v63 = vpop.f32.mrf.mxu0 }
 0x732   : > { %v1722_v1 = vadd.f32 %v2318_v4, %v1721_v63 }
 0x734   : > { %v1728_v2 = vadd.f32 %v1722_v1, %v1609_v41 }
 0x736   : > { %v1738_v5 = vsel %vm736_vm1, %v1728_v2, 0.0 }
 0x737   : > { %1739 = vadd.xlane.f32.xlu2 %v1738_v5 }
 0x739   : > { %v1723_v10 = vpop.f32.mrf.mxu0 }
 0x73a   : > { %v1724_v13 = vadd.f32 %v2318_v4, %v1723_v10 }
 0x73c   : > { %v1729_v14 = vadd.f32 %v1724_v13, %v1610_v33 }
 0x73e   : > { %v1741_v40 = vsel %vm736_vm1, %v1729_v14, 0.0 }
 0x73f   : > { %1742 = vadd.xlane.f32.xlu0 %v1741_v40 }
 0x789   : > { %v1734_v58 = vpop.xlane.xlu0 %1733 }
 0x78a   : > { %v1744_v17 = vmul.f32 %v1734_v58, %v2907_v61 }
 0x78c   : > { %v1748_v51 = vsub.f32 %v1726_v38, %v1744_v17 }
 0x78e   : > { %v1752_v25 = vmul.f32 %v1748_v51, %v1748_v51 }
 0x790   : > { %v1756_v6 = vsel %vm736_vm1, %v1752_v25, 0.0 }
 0x791   : > { %1757 = vadd.xlane.f32.xlu1 %v1756_v6  ;;  %v1737_v47 = vpop.xlane.xlu1 %1736 }
 0x792   : > { %v1745_v18 = vmul.f32 %v1737_v47, %v2907_v61 }
 0x794   : > { %v1749_v7 = vsub.f32 %v1727_v49, %v1745_v18 }
 0x796   : > { %v1753_v52 = vmul.f32 %v1749_v7, %v1749_v7 }
 0x798   : > { %v1759_v19 = vsel %vm736_vm1, %v1753_v52, 0.0 }
 0x799   : > { %1760 = vadd.xlane.f32.xlu2 %v1759_v19 }
 0x7aa   : > { %v1740_v20 = vpop.xlane.xlu2 %1739 }
 0x7ab   : > { %v1746_v21 = vmul.f32 %v1740_v20, %v2907_v61 }
 0x7ad   : > { %v2976_v8 = vsub.f32 %v1728_v2, %v1746_v21 }
 0x7af   : > { %v1754_v22 = vmul.f32 %v2976_v8, %v2976_v8 }
 0x7b1   : > { %v1762_v23 = vsel %vm736_vm1, %v1754_v22, 0.0 }
 0x7b2   : > { %v1743_v24 = vpop.xlane.xlu0 %1742  ;;  %1763 = vadd.xlane.f32.xlu0 %v1762_v23 }
 0x7b3   : > { %v1747_v9 = vmul.f32 %v1743_v24, %v2907_v61 }
 0x7b5   : > { %v2982_v35 = vsub.f32 %v1729_v14, %v1747_v9 }
 0x7b7   : > { %v1755_v27 = vmul.f32 %v2982_v35, %v2982_v35 }
 0x7b9   : > { %v1765_v26 = vsel %vm736_vm1, %v1755_v27, 0.0 }
 0x7ba   : > { %1766 = vadd.xlane.f32.xlu1 %v1765_v26 }
 0x804   : > { %v1758_v28 = vpop.xlane.xlu1 %1757 }
 0x805   : > { %v1768_v16 = vmul.f32 %v1758_v28, %v2907_v61 }
 0x807   : > { %v1772_v30 = vadd.f32 1e-05, %v1768_v16 }
 0x809   : > { %2395 = vrsqrt.f32 %v1772_v30  ;;  %vm1782_vm5 = vweird.f32 %v1772_v30 }
 0x80c   : > { %v1761_v31 = vpop.xlane.xlu2 %1760 }
 0x80d   : > { %v1769_v41 = vmul.f32 %v1761_v31, %v2907_v61 }
 0x80f   : > { %v2396_v33 = vpop.eup %2395  ;;  %v1773_v34 = vadd.f32 1e-05, %v1769_v41 }
 0x810   : > { %v1777_v37 = vmul.f32 %v2396_v33, %v1772_v30  ;;  %vm1783_vm4 = vweird.f32 %v2396_v33 }
 0x811   : > { %2397 = vrsqrt.f32 %v1773_v34  ;;  %vm1784_vm6 = vmor %vm1782_vm5, %vm1783_vm4  ;;  %vm1792_vm8 = vweird.f32 %v1773_v34 }
 0x812   : > { %v1778_v39 = vmul.f32 %v2396_v33, %v1777_v37 }
 0x814   : > { %v1779_v32 = vmul.f32 0.5, %v1778_v39 }
 0x816   : > { %v1780_v3 = vsub.f32 1.5, %v1779_v32 }
 0x817   : > { %v2398_v42 = vpop.eup %2397 }
 0x818   : > { %v1781_v59 = vmul.f32 %v2396_v33, %v1780_v3  ;;  %v1787_v43 = vmul.f32 %v2398_v42, %v1773_v34  ;;  %vm1793_vm7 = vweird.f32 %v2398_v42 }
 0x819   : > { %vm1794_vm9 = vmor %vm1792_vm8, %vm1793_vm7 }
 0x81a   : > { %v1785_v46 = vsel %vm1784_vm6, %v2396_v33, %v1781_v59  ;;  %v1788_v48 = vmul.f32 %v2398_v42, %v1787_v43 }
 0x81b   : > { %v1816_v12 = vmul.f32 %v1785_v46, %v1748_v51 }
 0x81c   : > { %v1789_v29 = vmul.f32 0.5, %v1788_v48 }
 0x81d   : > { %v1823_v15 = vmul.f32 %v2319_v44, %v1816_v12 }
 0x81e   : > { %v1790_v36 = vsub.f32 1.5, %v1789_v29 }
 0x81f   : > { %v2999_v53 = vadd.f32 %v2320_v11, %v1823_v15 }
 0x820   : > { %v1791_v54 = vmul.f32 %v2398_v42, %v1790_v36 }
 0x822   : > { %v1795_v50 = vsel %vm1794_vm9, %v2398_v42, %v1791_v54 }
 0x823   : > { %v1817_v55 = vmul.f32 %v1795_v50, %v1749_v7 }
 0x825   : > { %v1824_v4 = vmul.f32 %v2319_v44, %v1817_v55  ;;  %v1764_v56 = vpop.xlane.xlu0 %1763 }
 0x826   : > { %v1770_v57 = vmul.f32 %v1764_v56, %v2907_v61 }
 0x827   : > { %v3002_v38 = vadd.f32 %v2320_v11, %v1824_v4 }
 0x828   : > { %v1774_v0 = vadd.f32 1e-05, %v1770_v57 }
 0x82a   : > { %2399 = vrsqrt.f32 %v1774_v0  ;;  %vm1802_vm11 = vweird.f32 %v1774_v0 }
 0x82d   : > { %v1767_v60 = vpop.xlane.xlu1 %1766 }
 0x82e   : > { %v1771_v45 = vmul.f32 %v1767_v60, %v2907_v61 }
 0x830   : > { %v2400_v49 = vpop.eup %2399  ;;  %v1775_v62 = vadd.f32 1e-05, %v1771_v45 }
 0x831   : > { %v1797_v63 = vmul.f32 %v2400_v49, %v1774_v0  ;;  %vm1803_vm10 = vweird.f32 %v2400_v49 }
 0x832   : > { %2401 = vrsqrt.f32 %v1775_v62  ;;  %vm1804_vm12 = vmor %vm1802_vm11, %vm1803_vm10  ;;  %vm1812_vm14 = vweird.f32 %v1775_v62 }
 0x833   : > { %v1798_v1 = vmul.f32 %v2400_v49, %v1797_v63 }
 0x835   : > { %v1799_v2 = vmul.f32 0.5, %v1798_v1 }
 0x837   : > { %v1800_v5 = vsub.f32 1.5, %v1799_v2 }
 0x838   : > { %v2402_v10 = vpop.eup %2401 }
 0x839   : > { %v1801_v13 = vmul.f32 %v2400_v49, %v1800_v5  ;;  %v1807_v14 = vmul.f32 %v2402_v10, %v1775_v62  ;;  %vm1813_vm13 = vweird.f32 %v2402_v10 }
 0x83a   : > { %vm1814_vm15 = vmor %vm1812_vm14, %vm1813_vm13 }
 0x83b   : > { %v1805_v40 = vsel %vm1804_vm12, %v2400_v49, %v1801_v13  ;;  %v1808_v58 = vmul.f32 %v2402_v10, %v1807_v14 }
 0x83c   : > { %v1818_v17 = vmul.f32 %v1805_v40, %v2976_v8 }
 0x83d   : > { %v1809_v51 = vmul.f32 0.5, %v1808_v58 }
 0x83e   : > { %v1825_v25 = vmul.f32 %v2319_v44, %v1818_v17 }
 0x83f   : > { %v1810_v6 = vsub.f32 1.5, %v1809_v51 }
 0x840   : > { %v1832_v47 = vadd.f32 %v2320_v11, %v1825_v25 }
 0x841   : > { %v1811_v18 = vmul.f32 %v2402_v10, %v1810_v6 }
 0x843   : > { %v1815_v7 = vsel %vm1814_vm15, %v2402_v10, %v1811_v18 }
 0x844   : > { %v1819_v52 = vmul.f32 %v1815_v7, %v2982_v35  ;;  %1837 = sbr.rel (%p2220_p6) target bundleno = 2125 (0x84d), region = 88 }
 0x846   : > { %v1826_v19 = vmul.f32 %v2319_v44, %v1819_v52 }
 0x848   : > { %v1833_v20 = vadd.f32 %v2320_v11, %v1826_v19 }
 0x849   : > { %1838 = vst.msk [vmem:[#allocation2] sm:$0xff] %vm736_vm1, %v2999_v53 }
 0x84a   : > { %1839 = vst.msk [vmem:[#allocation2 + $0x8] sm:$0xff] %vm736_vm1, %v3002_v38 }
 0x84b   : > { %1840 = vst.msk [vmem:[#allocation2 + $0x10] sm:$0xff] %vm736_vm1, %v1832_v47 }
 0x84c   : > { %1841 = vst.msk [vmem:[#allocation2 + $0x18] sm:$0xff] %vm736_vm1, %v1833_v20 }
 0x84d PF: > { %p2221_p7 = scmp.ne.s32.totalorder %s2459_s18, 1 }
 0x84e   : > { %s3112_s23 = sld [smem:[#allocation11_spill]] (!%p2221_p7) }
 0x84f   : > { %1845 = sbr.rel (%p2221_p7) target bundleno = 2410 (0x96a), region = 92  ;;  %s3113_s30 = sld [smem:[#allocation12_spill]] (!%p2221_p7) }
 0x854   : > { %v1854_v21 = vsel %vm736_vm1, %v1832_v47, 0.0  ;;  %v1848_v8 = vsel %vm736_vm1, %v2999_v53, 0.0  ;;  %v1857_v22 = vsel %vm736_vm1, %v1833_v20, 0.0  ;;  %v1851_v23 = vsel %vm736_vm1, %v3002_v38, 0.0  ;;  %v2403_v13 = vld [vmem:[%s3112_s23] ss:$0 sm:$0xff] }
 0x855   : > { %1855 = vadd.xlane.f32.xlu1 %v1854_v21  ;;  %1849 = vadd.xlane.f32.xlu0 %v1848_v8  ;;  %v2404_v25 = vld [vmem:[%s3113_s30] ss:$0 sm:$0xff] }
 0x85d   : > { %1858 = vadd.xlane.f32.xlu1 %v1857_v22  ;;  %1852 = vadd.xlane.f32.xlu0 %v1851_v23 }
 0x8c8   : > { %v1856_v24 = vpop.xlane.xlu1 %1855  ;;  %v1850_v9 = vpop.xlane.xlu0 %1849 }
 0x8c9   : > { %v1862_v35 = vmul.f32 %v1856_v24, %v2907_v61  ;;  %v1860_v27 = vmul.f32 %v1850_v9, %v2907_v61 }
 0x8cb   : > { %v3023_v26 = vsub.f32 %v1832_v47, %v1862_v35  ;;  %v1864_v28 = vsub.f32 %v2999_v53, %v1860_v27 }
 0x8cd   : > { %v1870_v16 = vmul.f32 %v3023_v26, %v3023_v26  ;;  %v1868_v30 = vmul.f32 %v1864_v28, %v1864_v28 }
 0x8cf   : > { %v1878_v31 = vsel %vm736_vm1, %v1870_v16, 0.0  ;;  %v1872_v41 = vsel %vm736_vm1, %v1868_v30, 0.0 }
 0x8d0   : > { %v1859_v33 = vpop.xlane.xlu1 %1858  ;;  %1879 = vadd.xlane.f32.xlu0 %v1878_v31  ;;  %1873 = vadd.xlane.f32.xlu2 %v1872_v41  ;;  %v1853_v34 = vpop.xlane.xlu0 %1852 }
 0x8d1   : > { %v1863_v37 = vmul.f32 %v1859_v33, %v2907_v61  ;;  %v1861_v39 = vmul.f32 %v1853_v34, %v2907_v61 }
 0x8d3   : > { %v3032_v32 = vsub.f32 %v1833_v20, %v1863_v37  ;;  %v3035_v3 = vsub.f32 %v3002_v38, %v1861_v39 }
 0x8d5   : > { %v1871_v42 = vmul.f32 %v3032_v32, %v3032_v32  ;;  %v1869_v59 = vmul.f32 %v3035_v3, %v3035_v3 }
 0x8d7   : > { %v1881_v43 = vsel %vm736_vm1, %v1871_v42, 0.0  ;;  %v1875_v44 = vsel %vm736_vm1, %v1869_v59, 0.0 }
 0x8d8   : > { %1882 = vadd.xlane.f32.xlu1 %v1881_v43  ;;  %1876 = vadd.xlane.f32.xlu2 %v1875_v44 }
 0x943   : > { %v1874_v46 = vpop.xlane.xlu2 %1873  ;;  %v1880_v48 = vpop.xlane.xlu0 %1879 }
 0x944   : > { %v1884_v11 = vmul.f32 %v1874_v46, %v2907_v61  ;;  %v1886_v12 = vmul.f32 %v1880_v48, %v2907_v61 }
 0x946   : > { %v1888_v29 = vadd.f32 1e-05, %v1884_v11  ;;  %v1890_v15 = vadd.f32 1e-05, %v1886_v12 }
 0x948   : > { %2405 = vrsqrt.f32 %v1888_v29  ;;  %vm1898_vm3 = vweird.f32 %v1888_v29  ;;  %vm1918_vm5 = vweird.f32 %v1890_v15 }
 0x949   : > { %2407 = vrsqrt.f32 %v1890_v15 }
 0x94b   : > { %v1883_v36 = vpop.xlane.xlu1 %1882  ;;  %v1877_v53 = vpop.xlane.xlu2 %1876 }
 0x94c   : > { %v1887_v54 = vmul.f32 %v1883_v36, %v2907_v61  ;;  %v1885_v50 = vmul.f32 %v1877_v53, %v2907_v61 }
 0x94e   : > { %v2406_v55 = vpop.eup %2405  ;;  %v1891_v4 = vadd.f32 1e-05, %v1887_v54  ;;  %v1889_v56 = vadd.f32 1e-05, %v1885_v50 }
 0x94f   : > { %v2408_v57 = vpop.eup %2407  ;;  %v1893_v38 = vmul.f32 %v2406_v55, %v1888_v29  ;;  %vm1899_vm0 = vweird.f32 %v2406_v55 }
 0x950   : > { %v1913_v0 = vmul.f32 %v2408_v57, %v1890_v15  ;;  %2409 = vrsqrt.f32 %v1891_v4  ;;  %vm1919_vm2 = vweird.f32 %v2408_v57  ;;  %vm1900_vm4 = vmor %vm1898_vm3, %vm1899_vm0  ;;  %vm1928_vm9 = vweird.f32 %v1891_v4 }
 0x951   : > { %v1894_v60 = vmul.f32 %v2406_v55, %v1893_v38  ;;  %2411 = vrsqrt.f32 %v1889_v56  ;;  %vm1920_vm6 = vmor %vm1918_vm5, %vm1919_vm2  ;;  %vm1908_vm11 = vweird.f32 %v1889_v56 }
 0x952   : > { %v1914_v45 = vmul.f32 %v2408_v57, %v1913_v0 }
 0x953   : > { %v1895_v49 = vmul.f32 0.5, %v1894_v60 }
 0x954   : > { %v1915_v62 = vmul.f32 0.5, %v1914_v45 }
 0x955   : > { %v1896_v63 = vsub.f32 1.5, %v1895_v49 }
 0x956   : > { %v2410_v1 = vpop.eup %2409  ;;  %v1916_v2 = vsub.f32 1.5, %v1915_v62 }
 0x957   : > { %v2412_v5 = vpop.eup %2411  ;;  %v1897_v10 = vmul.f32 %v2406_v55, %v1896_v63  ;;  %v1923_v61 = vmul.f32 %v2410_v1, %v1891_v4  ;;  %vm1929_vm7 = vweird.f32 %v2410_v1 }
 0x958   : > { %v1917_v14 = vmul.f32 %v2408_v57, %v1916_v2  ;;  %v1903_v40 = vmul.f32 %v2412_v5, %v1889_v56  ;;  %vm1909_vm8 = vweird.f32 %v2412_v5  ;;  %vm1930_vm10 = vmor %vm1928_vm9, %vm1929_vm7 }
 0x959   : > { %v1901_v58 = vsel %vm1900_vm4, %v2406_v55, %v1897_v10  ;;  %v1924_v17 = vmul.f32 %v2410_v1, %v1923_v61  ;;  %vm1910_vm12 = vmor %vm1908_vm11, %vm1909_vm8 }
 0x95a   : > { %v1932_v51 = vmul.f32 %v1901_v58, %v1864_v28  ;;  %v1921_v6 = vsel %vm1920_vm6, %v2408_v57, %v1917_v14  ;;  %v1904_v47 = vmul.f32 %v2412_v5, %v1903_v40 }
 0x95b   : > { %v1934_v18 = vmul.f32 %v1921_v6, %v3023_v26  ;;  %v1925_v7 = vmul.f32 0.5, %v1924_v17 }
 0x95c   : > { %v1939_v52 = vmul.f32 %v2403_v13, %v1932_v51  ;;  %v1905_v19 = vmul.f32 0.5, %v1904_v47 }
 0x95d   : > { %v1941_v20 = vmul.f32 %v2403_v13, %v1934_v18  ;;  %v1926_v21 = vsub.f32 1.5, %v1925_v7 }
 0x95e   : > { %v1946_v8 = vadd.f32 %v2404_v25, %v1939_v52  ;;  %v1906_v22 = vsub.f32 1.5, %v1905_v19 }
 0x95f   : > { %v1948_v23 = vadd.f32 %v2404_v25, %v1941_v20  ;;  %v1927_v24 = vmul.f32 %v2410_v1, %v1926_v21 }
 0x960   : > { %1950 = vst.msk [vmem:[#allocation2] sm:$0xff] %vm736_vm1, %v1946_v8  ;;  %v1907_v9 = vmul.f32 %v2412_v5, %v1906_v22 }
 0x961   : > { %1952 = vst.msk [vmem:[#allocation2 + $0x10] sm:$0xff] %vm736_vm1, %v1948_v23  ;;  %v1931_v35 = vsel %vm1930_vm10, %v2410_v1, %v1927_v24 }
 0x962   : > { %v1935_v27 = vmul.f32 %v1931_v35, %v3032_v32  ;;  %v1911_v26 = vsel %vm1910_vm12, %v2412_v5, %v1907_v9 }
 0x963   : > { %v1933_v28 = vmul.f32 %v1911_v26, %v3035_v3 }
 0x964   : > { %v1942_v16 = vmul.f32 %v2403_v13, %v1935_v27 }
 0x965   : > { %v1940_v30 = vmul.f32 %v2403_v13, %v1933_v28 }
 0x966   : > { %v1949_v31 = vadd.f32 %v2404_v25, %v1942_v16 }
 0x967   : > { %v1947_v41 = vadd.f32 %v2404_v25, %v1940_v30 }
 0x968   : > { %1953 = vst.msk [vmem:[#allocation2 + $0x18] sm:$0xff] %vm736_vm1, %v1949_v31 }
 0x969   : > { %1951 = vst.msk [vmem:[#allocation2 + $0x8] sm:$0xff] %vm736_vm1, %v1947_v41 }
 0x96a PF: > { %s3114_s24 = sld [smem:[#allocation6_spill]]  ;;  %s2478_s20 = smov [#allocation2]  }
 0x96b   : > { %s3116_s19 = sld [smem:[#allocation13_spill]]  ;;  %s1963_s15 = sshll.u32 %s2478_s20, 4  ;;  %s1964_s15 = int_to_ptr.vmem [resolvable:$true] %s1963_s15 }
 0x96c   : > { %s2479_s26 = smov 128  }
 0x970   : > { %s3115_s28 = sadd.s32 4294967295, %s3114_s24  }
 0x971   : > { %p2246_p8 = scmp.eq.s32.totalorder %s3115_s28, 1  ;;  %s1965_s3 = sshll.u32 %s3116_s19, 4  ;;  %s1966_s3 = int_to_ptr.hbm [resolvable:$true] %s1965_s3 }
 0x973   : > { %2243 = dma.vmem_to_hbm [thread:$0]  (%p2246_p8), %s1964_s15, 512, %s1966_s3, [#allocation3], %s2479_s26, %s2479_s26, %s2474_s14  }
 0x974   : > { %2454 = dma.done.wait (%p2246_p8), [#allocation3], 512  }
 0x975   : > { %2456 = vsyncadd (%p2246_p8), [#allocation3], 4294966784 }
 0x976 PF: > { %s3117_s0 = sld [smem:[#allocation6_spill]] }
 0x977   : > { %s3118_s18 = sld [smem:[#allocation5_spill]] }
 0x978   : > { %s3119_s19 = sld [smem:[#allocation7_spill]] }
 0x97c   : > { %s26_s20 = sadd.s32 1, %s3117_s0  }
 0x97d   : > { %p23_p9 = scmp.ge.s32.totalorder %s26_s20, 4  }
 0x97f   :  { %25 = sbr.rel (!%p23_p9) target bundleno = 9 (0x9), region = 156 }
 0x984   :  { %1982 = vsyncpa [#allocation3], 1 }
 0x985   :  { %1984 = vsyncpa [#allocation3 + $0x1], 1 }

</bundles_post_ra>
